<compile_context>
chip_gen: v7x
topology: tpu7x:2x2x1
jax: 0.10.0
libtpu: 0.0.40
codegen_flags: <defaults>
</compile_context>

<pallas_src>
import functools

import jax
import jax.numpy as jnp
from jax.experimental import pallas as pl
from jax.experimental.pallas import tpu as pltpu


def _round_up(n: int, m: int) -> int:
    return ((n + m - 1) // m) * m


def _vmem_limit_bytes() -> int:
    """~75% of physical VMEM: 96 MiB on v5e/v6e (128 MiB), 48 MiB on v7x (64 MiB)."""
    cap = 128 * 1024 * 1024
    try:
        cap = int(getattr(pltpu.get_tpu_info(), "vmem_capacity_bytes", cap)) or cap
    except Exception:
        pass
    return max((cap * 3) // 4, 32 * 1024 * 1024)


def _batch_axis_semantics():
    """(dimension_semantics, num_tensorcores) for the batch grid axis."""
    try:
        kind = jax.devices()[0].device_kind.lower()
    except Exception:
        kind = ""
    if "v7" in kind:
        # 2 TensorCores per chip: shard the batch axis across them.
        return (pltpu.CORE_PARALLEL,), 2
    return ("parallel",), 1


def skip_connection_kernel(x_ref, w1_ref, b1_ref, w2_ref, b2_ref, o_ref):
    # x tile: (tb, H) f32.  Weights: (H, H) bf16, resident across the grid.
    # Biases: (1, H) f32.  MXU matmuls use bf16 operands + f32 accumulation;
    # all elementwise math (bias, ReLU, residual) is f32 on the VPU.
    x = x_ref[...]
    h = jnp.dot(x.astype(jnp.bfloat16), w1_ref[...],
                preferred_element_type=jnp.float32) + b1_ref[...]
    h = jnp.maximum(h, 0.0)
    y = jnp.dot(h.astype(jnp.bfloat16), w2_ref[...],
                preferred_element_type=jnp.float32) + b2_ref[...]
    o_ref[...] = (x + y).astype(o_ref.dtype)


def prepare_skip_params(w1, b1, w2, b2):
    """One-time (model-init) parameter prep: bf16 weights, (1, H) f32 biases.

    Hoisted out of the per-call path so repeated calls don't re-read /
    re-write O(H^2) bytes of weights just to rebuild the same bf16 copies.
    """
    H = w1.shape[0]
    return (w1.astype(jnp.bfloat16),
            jnp.reshape(b1, (1, H)).astype(jnp.float32),
            w2.astype(jnp.bfloat16),
            jnp.reshape(b2, (1, H)).astype(jnp.float32))


@functools.partial(jax.jit, static_argnames=("block_b", "single_buffer_weights"))
def _skip_connection(x, w1, b1, w2, b2, *, block_b, single_buffer_weights):
    B, H = x.shape
    semantics, num_tc = _batch_axis_semantics()

    # Large batch tiles: HBM-bound regime for small/moderate H, so fewer,
    # bigger grid steps (each ~0.35 us fixed overhead) hit a higher roofline.
    tb = min(block_b, _round_up(B, 8))
    if num_tc > 1:  # make sure every TensorCore gets at least one tile
        tb = min(tb, _round_up(pl.cdiv(B, num_tc), 8))
    nb = pl.cdiv(B, tb)  # ragged last block handled by Pallas (masked writes)

    # Weights/biases have constant index_maps -> single resident VMEM copy.
    w_kwargs = dict(pipeline_mode=pl.Buffered(1)) if single_buffer_weights else {}

    return pl.pallas_call(
        skip_connection_kernel,
        out_shape=jax.ShapeDtypeStruct((B, H), x.dtype),
        grid=(nb,),
        in_specs=[
            pl.BlockSpec((tb, H), lambda i: (i, 0)),             # x: streamed
            pl.BlockSpec((H, H), lambda i: (0, 0), **w_kwargs),  # w1: resident
            pl.BlockSpec((1, H), lambda i: (0, 0), **w_kwargs),  # b1
            pl.BlockSpec((H, H), lambda i: (0, 0), **w_kwargs),  # w2
            pl.BlockSpec((1, H), lambda i: (0, 0), **w_kwargs),  # b2
        ],
        out_specs=pl.BlockSpec((tb, H), lambda i: (i, 0)),
        compiler_params=pltpu.CompilerParams(
            dimension_semantics=semantics,
            vmem_limit_bytes=_vmem_limit_bytes(),
        ),
    )(x, w1, b1, w2, b2)


def skip_connection(x, w1_bf16, b1, w2_bf16, b2, *, block_b=512):
    """forward(x) = x + relu(x @ W1 + b1) @ W2 + b2 (params from prepare_skip_params)."""
    try:
        return _skip_connection(x, w1_bf16, b1, w2_bf16, b2,
                                block_b=block_b, single_buffer_weights=True)
    except Exception:
        # Fallback for jax builds that reject BlockSpec pipeline_mode / Buffered(1).
        return _skip_connection(x, w1_bf16, b1, w2_bf16, b2,
                                block_b=block_b, single_buffer_weights=False)


def skip_connection_ref_f32(x, w1, b1, w2, b2):
    h = jnp.maximum(x @ w1 + b1.reshape(1, -1), 0.0)
    return x + (h @ w2 + b2.reshape(1, -1))


def skip_connection_ref_bf16(x, w1, b1, w2, b2):
    # Mirrors the kernel's mixed precision (bf16 matmul operands, f32 acc).
    h = jnp.dot(x.astype(jnp.bfloat16), w1.astype(jnp.bfloat16),
                preferred_element_type=jnp.float32) + b1.reshape(1, -1)
    h = jnp.maximum(h, 0.0)
    y = jnp.dot(h.astype(jnp.bfloat16), w2.astype(jnp.bfloat16),
                preferred_element_type=jnp.float32) + b2.reshape(1, -1)
    return x + y


if __name__ == "__main__":
    H = 32  # walker-MLP hidden size

    key = jax.random.PRNGKey(0)
    kx, k1, kb1, k2, kb2, kx2 = jax.random.split(key, 6)

    # Deterministic init in (in, out) layout, like uniform(-1/sqrt(H), 1/sqrt(H)).
    scale = 1.0 / jnp.sqrt(jnp.float32(H))
    w1 = jax.random.uniform(k1, (H, H), jnp.float32, -scale, scale)
    b1 = jax.random.uniform(kb1, (H,), jnp.float32, -scale, scale)
    w2 = jax.random.uniform(k2, (H, H), jnp.float32, -scale, scale)
    b2 = jax.random.uniform(kb2, (H,), jnp.float32, -scale, scale)

    # One-time parameter prep (bf16 weights, (1, H) f32 biases).
    params = prepare_skip_params(w1, b1, w2, b2)

    # Case 1: B=512 -> a single (512, 32) grid step (per review: big batch tile).
    x = jax.random.normal(kx, (512, H), dtype=jnp.float32)
    out = jax.block_until_ready(skip_connection(x, *params))
    assert out.shape == (512, H) and out.dtype == jnp.float32
    # Tight check vs. a reference doing the same bf16-operand / f32-acc math.
    assert jnp.allclose(out, skip_connection_ref_bf16(x, w1, b1, w2, b2),
                        atol=2e-3, rtol=2e-3)
    # Loose check vs. pure f32 math (bounds the bf16 rounding error).
    assert jnp.allclose(out, skip_connection_ref_f32(x, w1, b1, w2, b2),
                        atol=5e-2, rtol=5e-2)

    # Case 2: ragged batch (B=200, tb=64 -> 4 pipelined steps, masked last block).
    x2 = jax.random.normal(kx2, (200, H), dtype=jnp.float32)
    out2 = jax.block_until_ready(skip_connection(x2, *params, block_b=64))
    assert out2.shape == (200, H) and out2.dtype == jnp.float32
    assert jnp.allclose(out2, skip_connection_ref_bf16(x2, w1, b1, w2, b2),
                        atol=2e-3, rtol=2e-3)

    print("KERNEL_OK")
</pallas_src>

<mosaic_0001>
module attributes {stable_mosaic.version = 11 : i64} {
  func.func @skip_connection_kernel(%arg0: i32, %arg1: memref<512x32xf32, #tpu.memory_space<vmem>>, %arg2: memref<32x32xbf16, #tpu.memory_space<vmem>>, %arg3: memref<1x32xf32, #tpu.memory_space<vmem>>, %arg4: memref<32x32xbf16, #tpu.memory_space<vmem>>, %arg5: memref<1x32xf32, #tpu.memory_space<vmem>>, %arg6: memref<512x32xf32, #tpu.memory_space<vmem>>) attributes {dimension_semantics = [#tpu.dimension_semantics<parallel>], iteration_bounds = array<i64: 1>, scalar_prefetch = 0 : i64, scratch_operands = 0 : i64, tpu.core_type = #tpu.core_type<tc>, window_params = [{transform_indices = @transform_0, window_bounds = array<i64: 512, 32>}, {pipeline_mode = #tpu.pipeline_mode<synchronous>, transform_indices = @transform_1, window_bounds = array<i64: 32, 32>}, {pipeline_mode = #tpu.pipeline_mode<synchronous>, transform_indices = @transform_2, window_bounds = array<i64: 1, 32>}, {pipeline_mode = #tpu.pipeline_mode<synchronous>, transform_indices = @transform_3, window_bounds = array<i64: 32, 32>}, {pipeline_mode = #tpu.pipeline_mode<synchronous>, transform_indices = @transform_4, window_bounds = array<i64: 1, 32>}, {transform_indices = @transform_5, window_bounds = array<i64: 512, 32>}]} {
    %c0 = arith.constant 0 : index
    %c0_0 = arith.constant 0 : index
    %0 = vector.load %arg1[%c0, %c0_0] : memref<512x32xf32, #tpu.memory_space<vmem>>, vector<512x32xf32>
    %1 = arith.truncf %0 : vector<512x32xf32> to vector<512x32xbf16>
    %c0_1 = arith.constant 0 : index
    %c0_2 = arith.constant 0 : index
    %2 = vector.load %arg2[%c0_1, %c0_2] : memref<32x32xbf16, #tpu.memory_space<vmem>>, vector<32x32xbf16>
    %cst = arith.constant dense<0.000000e+00> : vector<512x32xf32>
    %3 = tpu.matmul %1, %2, %cst {dimension_numbers = #tpu.dot_dimension_numbers<[1], [0], [0], [1], [0, 0, 1, 1], [], []>} : vector<512x32xbf16>, vector<32x32xbf16>, vector<512x32xf32> -> vector<512x32xf32>
    %c0_3 = arith.constant 0 : index
    %c0_4 = arith.constant 0 : index
    %4 = vector.load %arg3[%c0_3, %c0_4] : memref<1x32xf32, #tpu.memory_space<vmem>>, vector<1x32xf32>
    %5 = vector.broadcast %4 : vector<1x32xf32> to vector<512x32xf32>
    %6 = arith.addf %3, %5 : vector<512x32xf32>
    %cst_5 = arith.constant 0.000000e+00 : f32
    %7 = vector.broadcast %cst_5 : f32 to vector<512x32xf32>
    %8 = arith.maximumf %6, %7 : vector<512x32xf32>
    %9 = arith.truncf %8 : vector<512x32xf32> to vector<512x32xbf16>
    %c0_6 = arith.constant 0 : index
    %c0_7 = arith.constant 0 : index
    %10 = vector.load %arg4[%c0_6, %c0_7] : memref<32x32xbf16, #tpu.memory_space<vmem>>, vector<32x32xbf16>
    %cst_8 = arith.constant dense<0.000000e+00> : vector<512x32xf32>
    %11 = tpu.matmul %9, %10, %cst_8 {dimension_numbers = #tpu.dot_dimension_numbers<[1], [0], [0], [1], [0, 0, 1, 1], [], []>} : vector<512x32xbf16>, vector<32x32xbf16>, vector<512x32xf32> -> vector<512x32xf32>
    %c0_9 = arith.constant 0 : index
    %c0_10 = arith.constant 0 : index
    %12 = vector.load %arg5[%c0_9, %c0_10] : memref<1x32xf32, #tpu.memory_space<vmem>>, vector<1x32xf32>
    %13 = vector.broadcast %12 : vector<1x32xf32> to vector<512x32xf32>
    %14 = arith.addf %11, %13 : vector<512x32xf32>
    %15 = arith.addf %0, %14 : vector<512x32xf32>
    %c0_11 = arith.constant 0 : index
    %c0_12 = arith.constant 0 : index
    %16 = vector.load %arg6[%c0_11, %c0_12] : memref<512x32xf32, #tpu.memory_space<vmem>>, vector<512x32xf32>
    tpu.vector_store %arg6[%c0_11, %c0_12], %15 {strides = array<i32>} : memref<512x32xf32, #tpu.memory_space<vmem>>, vector<512x32xf32>,
    return
  }
  func.func @transform_0(%arg0: i32) -> (i32, i32) {
    %c0_i32 = arith.constant 0 : i32
    %c0_i32_0 = arith.constant 0 : i32
    return %arg0, %c0_i32 : i32, i32
  }
  func.func @transform_1(%arg0: i32) -> (i32, i32) {
    %c0_i32 = arith.constant 0 : i32
    %c0_i32_0 = arith.constant 0 : i32
    %c0_i32_1 = arith.constant 0 : i32
    return %c0_i32, %c0_i32_0 : i32, i32
  }
  func.func @transform_2(%arg0: i32) -> (i32, i32) {
    %c0_i32 = arith.constant 0 : i32
    %c0_i32_0 = arith.constant 0 : i32
    %c0_i32_1 = arith.constant 0 : i32
    return %c0_i32, %c0_i32_0 : i32, i32
  }
  func.func @transform_3(%arg0: i32) -> (i32, i32) {
    %c0_i32 = arith.constant 0 : i32
    %c0_i32_0 = arith.constant 0 : i32
    %c0_i32_1 = arith.constant 0 : i32
    return %c0_i32, %c0_i32_0 : i32, i32
  }
  func.func @transform_4(%arg0: i32) -> (i32, i32) {
    %c0_i32 = arith.constant 0 : i32
    %c0_i32_0 = arith.constant 0 : i32
    %c0_i32_1 = arith.constant 0 : i32
    return %c0_i32, %c0_i32_0 : i32, i32
  }
  func.func @transform_5(%arg0: i32) -> (i32, i32) {
    %c0_i32 = arith.constant 0 : i32
    %c0_i32_0 = arith.constant 0 : i32
    return %arg0, %c0_i32 : i32, i32
  }
}

module attributes {stable_mosaic.version = 11 : i64} {
  func.func @skip_connection_kernel(%arg0: i32, %arg1: memref<512x32xf32, #tpu.memory_space<vmem>>, %arg2: memref<32x32xbf16, #tpu.memory_space<vmem>>, %arg3: memref<1x32xf32, #tpu.memory_space<vmem>>, %arg4: memref<32x32xbf16, #tpu.memory_space<vmem>>, %arg5: memref<1x32xf32, #tpu.memory_space<vmem>>, %arg6: memref<512x32xf32, #tpu.memory_space<vmem>>) attributes {dimension_semantics = [#tpu.dimension_semantics<parallel>], iteration_bounds = array<i64: 1>, scalar_prefetch = 0 : i64, scratch_operands = 0 : i64, tpu.core_type = #tpu.core_type<tc>, window_params = [{transform_indices = @transform_0, window_bounds = array<i64: 512, 32>}, {pipeline_mode = #tpu.pipeline_mode<synchronous>, transform_indices = @transform_1, window_bounds = array<i64: 32, 32>}, {pipeline_mode = #tpu.pipeline_mode<synchronous>, transform_indices = @transform_2, window_bounds = array<i64: 1, 32>}, {pipeline_mode = #tpu.pipeline_mode<synchronous>, transform_indices = @transform_3, window_bounds = array<i64: 32, 32>}, {pipeline_mode = #tpu.pipeline_mode<synchronous>, transform_indices = @transform_4, window_bounds = array<i64: 1, 32>}, {transform_indices = @transform_5, window_bounds = array<i64: 512, 32>}]} {
    %c0 = arith.constant 0 : index
    %c0_0 = arith.constant 0 : index
    %0 = vector.load %arg1[%c0, %c0_0] : memref<512x32xf32, #tpu.memory_space<vmem>>, vector<512x32xf32>
    %1 = arith.truncf %0 : vector<512x32xf32> to vector<512x32xbf16>
    %c0_1 = arith.constant 0 : index
    %c0_2 = arith.constant 0 : index
    %2 = vector.load %arg2[%c0_1, %c0_2] : memref<32x32xbf16, #tpu.memory_space<vmem>>, vector<32x32xbf16>
    %cst = arith.constant dense<0.000000e+00> : vector<512x32xf32>
    %3 = tpu.matmul %1, %2, %cst {dimension_numbers = #tpu.dot_dimension_numbers<[1], [0], [0], [1], [0, 0, 1, 1], [], []>} : vector<512x32xbf16>, vector<32x32xbf16>, vector<512x32xf32> -> vector<512x32xf32>
    %c0_3 = arith.constant 0 : index
    %c0_4 = arith.constant 0 : index
    %4 = vector.load %arg3[%c0_3, %c0_4] : memref<1x32xf32, #tpu.memory_space<vmem>>, vector<1x32xf32>
    %5 = vector.broadcast %4 : vector<1x32xf32> to vector<512x32xf32>
    %6 = arith.addf %3, %5 : vector<512x32xf32>
    %cst_5 = arith.constant 0.000000e+00 : f32
    %7 = vector.broadcast %cst_5 : f32 to vector<512x32xf32>
    %8 = arith.maximumf %6, %7 : vector<512x32xf32>
    %9 = arith.truncf %8 : vector<512x32xf32> to vector<512x32xbf16>
    %c0_6 = arith.constant 0 : index
    %c0_7 = arith.constant 0 : index
    %10 = vector.load %arg4[%c0_6, %c0_7] : memref<32x32xbf16, #tpu.memory_space<vmem>>, vector<32x32xbf16>
    %cst_8 = arith.constant dense<0.000000e+00> : vector<512x32xf32>
    %11 = tpu.matmul %9, %10, %cst_8 {dimension_numbers = #tpu.dot_dimension_numbers<[1], [0], [0], [1], [0, 0, 1, 1], [], []>} : vector<512x32xbf16>, vector<32x32xbf16>, vector<512x32xf32> -> vector<512x32xf32>
    %c0_9 = arith.constant 0 : index
    %c0_10 = arith.constant 0 : index
    %12 = vector.load %arg5[%c0_9, %c0_10] : memref<1x32xf32, #tpu.memory_space<vmem>>, vector<1x32xf32>
    %13 = vector.broadcast %12 : vector<1x32xf32> to vector<512x32xf32>
    %14 = arith.addf %11, %13 : vector<512x32xf32>
    %15 = arith.addf %0, %14 : vector<512x32xf32>
    %c0_11 = arith.constant 0 : index
    %c0_12 = arith.constant 0 : index
    %16 = vector.load %arg6[%c0_11, %c0_12] : memref<512x32xf32, #tpu.memory_space<vmem>>, vector<512x32xf32>
    tpu.vector_store %arg6[%c0_11, %c0_12], %15 {strides = array<i32>} : memref<512x32xf32, #tpu.memory_space<vmem>>, vector<512x32xf32>,
    return
  }
  func.func @transform_0(%arg0: i32) -> (i32, i32) {
    %c0_i32 = arith.constant 0 : i32
    %c0_i32_0 = arith.constant 0 : i32
    return %arg0, %c0_i32 : i32, i32
  }
  func.func @transform_1(%arg0: i32) -> (i32, i32) {
    %c0_i32 = arith.constant 0 : i32
    %c0_i32_0 = arith.constant 0 : i32
    %c0_i32_1 = arith.constant 0 : i32
    return %c0_i32, %c0_i32_0 : i32, i32
  }
  func.func @transform_2(%arg0: i32) -> (i32, i32) {
    %c0_i32 = arith.constant 0 : i32
    %c0_i32_0 = arith.constant 0 : i32
    %c0_i32_1 = arith.constant 0 : i32
    return %c0_i32, %c0_i32_0 : i32, i32
  }
  func.func @transform_3(%arg0: i32) -> (i32, i32) {
    %c0_i32 = arith.constant 0 : i32
    %c0_i32_0 = arith.constant 0 : i32
    %c0_i32_1 = arith.constant 0 : i32
    return %c0_i32, %c0_i32_0 : i32, i32
  }
  func.func @transform_4(%arg0: i32) -> (i32, i32) {
    %c0_i32 = arith.constant 0 : i32
    %c0_i32_0 = arith.constant 0 : i32
    %c0_i32_1 = arith.constant 0 : i32
    return %c0_i32, %c0_i32_0 : i32, i32
  }
  func.func @transform_5(%arg0: i32) -> (i32, i32) {
    %c0_i32 = arith.constant 0 : i32
    %c0_i32_0 = arith.constant 0 : i32
    return %arg0, %c0_i32 : i32, i32
  }
}

</mosaic_0001>

<bundles_post_ra>
// kernel: _skip_connection.1
= control target key start
LH: loop header
LB: loop body
LE: loop exit
PB: predicated region body
PF: predicated region fallthrough
CT: control target
= control target key end

     0   :  { %10 = vsyncpa [#allocation3], 0  ;;  %s2292_s0 = inlined_call_operand.hbm [shape: f32[512,32], index: 0, kind: input, shape index: {}]   ;;  %s2293_s1 = inlined_call_operand.hbm [shape: bf16[32,32], index: 1, kind: input, shape index: {}]   ;;  %s2294_s2 = inlined_call_operand.hbm [shape: f32[1,32], index: 2, kind: input, shape index: {}]   ;;  %s2295_s3 = inlined_call_operand.hbm [shape: bf16[32,32], index: 3, kind: input, shape index: {}]   ;;  %s2296_s4 = inlined_call_operand.hbm [shape: f32[1,32], index: 4, kind: input, shape index: {}]   ;;  %s2297_s5 = inlined_call_operand.hbm [shape: f32[512,32], index: 5, kind: output, shape index: {}]  }
   0x1   :  { %11 = vsyncpa [#allocation6], 0 }
   0x2   :  { %12 = vsyncpa [#allocation9], 0 }
   0x3   :  { %13 = vsyncpa [#allocation4], 0  ;;  %s1674_s18 = smov [#allocation5]   ;;  %s1534_s22 = scalar_lea.hbm %s2293_s1, 256 }
   0x4   :  { %s31_s19 = sshll.u32 %s1674_s18, 4  ;;  %p1535_p0 = scmp.ne.s32.totalorder %s2293_s1, %s1534_s22  ;;  %s32_s19 = int_to_ptr.vmem [resolvable:$true] %s31_s19 }
   0x5   :  { %p1538_p1 = scmp.lt.u32.totalorder %s1534_s22, %s2293_s1 }
   0x7   :  { %p1540_p2 = pnand %p1538_p1, %p1535_p0 }
   0x9   :  { %1543 = shalt.err (!%p1540_p2)
}
   0xa   :  { %s1544_s27 = scalar_lea.vmem %s32_s19, 256  ;;  %p1549_p4 = scmp.lt.s32.totalorder %s32_s19, %s32_s19 }
   0xb   :  { %p1545_p3 = scmp.ne.s32.totalorder %s32_s19, %s1544_s27  ;;  %p1550_p5 = scmp.lt.s32.totalorder %s1544_s27, %s1544_s27 }
   0xd   :  { %p1551_p6 = por %p1550_p5, %p1549_p4 }
   0xf   :  { %p1552_p7 = pnand %p1551_p6, %p1545_p3 }
  0x11   :  { %1555 = shalt.err (!%p1552_p7)
}
  0x12   :  { %s1675_s28 = smov 64   ;;  %s1676_s29 = smov 4  }
  0x13   :  { %37 = dma.hbm_to_vmem [thread:$0]  %s2293_s1, 256, %s32_s19, [#allocation6], %s1675_s28, %s1675_s28, %s1676_s29  }
  0x14   :  { %s1677_s7 = smov [#allocation8]   ;;  %s1678_s9 = smov [#allocation2]  }
  0x15   :  { %s53_s8 = sshll.u32 %s1677_s7, 4  ;;  %s19_s10 = sshll.u32 %s1678_s9, 4  ;;  %s54_s8 = int_to_ptr.vmem [resolvable:$true] %s53_s8  ;;  %s20_s10 = int_to_ptr.vmem [resolvable:$true] %s19_s10 }
  0x16   :  { %s1556_s13 = scalar_lea.hbm %s2295_s3, 256 }
  0x17   :  { %p1557_p8 = scmp.ne.s32.totalorder %s2295_s3, %s1556_s13  ;;  %p1560_p9 = scmp.lt.u32.totalorder %s1556_s13, %s2295_s3 }
  0x19   :  { %p1562_p10 = pnand %p1560_p9, %p1557_p8 }
  0x1b   :  { %1565 = shalt.err (!%p1562_p10)
}
  0x1c   :  { %s1566_s1 = scalar_lea.vmem %s54_s8, 256  ;;  %p1571_p12 = scmp.lt.s32.totalorder %s54_s8, %s54_s8 }
  0x1d   :  { %p1567_p11 = scmp.ne.s32.totalorder %s54_s8, %s1566_s1  ;;  %p1572_p13 = scmp.lt.s32.totalorder %s1566_s1, %s1566_s1 }
  0x1f   :  { %p1573_p0 = por %p1572_p13, %p1571_p12 }
  0x21   :  { %p1574_p1 = pnand %p1573_p0, %p1567_p11 }
  0x23   :  { %1577 = shalt.err (!%p1574_p1)
}
  0x24   :  { %59 = dma.hbm_to_vmem [thread:$0]  %s2295_s3, 256, %s54_s8, [#allocation9], %s1675_s28, %s1675_s28, %s1676_s29  }
  0x25   :  { %s1578_s22 = scalar_lea.hbm %s2292_s0, 8192 }
  0x26   :  { %p1579_p2 = scmp.ne.s32.totalorder %s2292_s0, %s1578_s22  ;;  %p1582_p3 = scmp.lt.u32.totalorder %s1578_s22, %s2292_s0 }
  0x28   :  { %p1584_p4 = pnand %p1582_p3, %p1579_p2 }
  0x2a   :  { %1587 = shalt.err (!%p1584_p4)
}
  0x2b   :  { %s1588_s27 = scalar_lea.vmem %s20_s10, 8192  ;;  %p1593_p6 = scmp.lt.s32.totalorder %s20_s10, %s20_s10 }
  0x2c   :  { %p1589_p5 = scmp.ne.s32.totalorder %s20_s10, %s1588_s27  ;;  %p1594_p7 = scmp.lt.s32.totalorder %s1588_s27, %s1588_s27 }
  0x2e   :  { %p1595_p8 = por %p1594_p7, %p1593_p6 }
  0x30   :  { %p1596_p9 = pnand %p1595_p8, %p1589_p5 }
  0x32   :  { %1599 = shalt.err (!%p1596_p9)
}
  0x33   :  { %s1679_s3 = smov 128   ;;  %s1680_s28 = smov 8  }
  0x34   :  { %25 = dma.hbm_to_vmem [thread:$0]  %s2292_s0, 8192, %s20_s10, [#allocation3], %s1679_s3, %s1679_s3, %s1680_s28  }
  0x35   :  { %s1681_s6 = smov [#allocation7]   ;;  %s1682_s8 = smov [#allocation10]  }
  0x36   :  { %s44_s7 = sshll.u32 %s1681_s6, 4  ;;  %s66_s9 = sshll.u32 %s1682_s8, 4  ;;  %s45_s7 = int_to_ptr.vmem [resolvable:$true] %s44_s7  ;;  %s67_s9 = int_to_ptr.vmem [resolvable:$true] %s66_s9 }
  0x37   :  { %s1600_s13 = scalar_lea.hbm %s2294_s2, 16 }
  0x38   :  { %p1601_p10 = scmp.ne.s32.totalorder %s2294_s2, %s1600_s13  ;;  %p1604_p11 = scmp.lt.u32.totalorder %s1600_s13, %s2294_s2 }
  0x3a   :  { %p1606_p12 = pnand %p1604_p11, %p1601_p10 }
  0x3c   :  { %1609 = shalt.err (!%p1606_p12)
}
  0x3d   :  { %s1610_s0 = scalar_lea.vmem %s45_s7, 16  ;;  %s1614_s10 = scalar_lea.vmem %s45_s7, 32 }
  0x3e   :  { %p1611_p13 = scmp.ne.s32.totalorder %s45_s7, %s1610_s0  ;;  %p1615_p0 = scmp.lt.s32.totalorder %s45_s7, %s45_s7 }
  0x3f   :  { %p1616_p1 = scmp.lt.s32.totalorder %s1614_s10, %s1610_s0 }
  0x41   :  { %p1617_p2 = por %p1616_p1, %p1615_p0 }
  0x43   :  { %p1618_p3 = pnand %p1617_p2, %p1611_p13 }
  0x45   :  { %1621 = shalt.err (!%p1618_p3)
}
  0x46   :  { %47 = dma.hbm_to_vmem [thread:$0]  %s2294_s2, 16, %s45_s7, [#allocation6]  }
  0x47   :  { %s1622_s21 = scalar_lea.hbm %s2296_s4, 16 }
  0x48   :  { %p1623_p4 = scmp.ne.s32.totalorder %s2296_s4, %s1622_s21  ;;  %p1626_p5 = scmp.lt.u32.totalorder %s1622_s21, %s2296_s4 }
  0x4a   :  { %p1628_p6 = pnand %p1626_p5, %p1623_p4 }
  0x4c   :  { %1631 = shalt.err (!%p1628_p6)
}
  0x4d   :  { %s1632_s26 = scalar_lea.vmem %s67_s9, 16  ;;  %s1636_s27 = scalar_lea.vmem %s67_s9, 32 }
  0x4e   :  { %p1633_p7 = scmp.ne.s32.totalorder %s67_s9, %s1632_s26  ;;  %p1637_p8 = scmp.lt.s32.totalorder %s67_s9, %s67_s9 }
  0x4f   :  { %p1638_p9 = scmp.lt.s32.totalorder %s1636_s27, %s1632_s26 }
  0x51   :  { %p1639_p10 = por %p1638_p9, %p1637_p8 }
  0x53   :  { %p1640_p11 = pnand %p1639_p10, %p1633_p7 }
  0x55   :  { %1643 = shalt.err (!%p1640_p11)
}
  0x56   :  { %69 = dma.hbm_to_vmem [thread:$0]  %s2296_s4, 16, %s67_s9, [#allocation9]  }
  0x57   :  { %1666 = dma.done.wait [#allocation3], 8192  }
  0x58   :  { %1667 = vsyncadd [#allocation3], 4294959104 }
  0x59   :  { %1668 = dma.done.wait [#allocation6], 272  }
  0x5a   :  { %1669 = vsyncadd [#allocation6], 4294967024 }
  0x5b   :  { %1670 = dma.done.wait [#allocation9], 272  }
  0x5c   :  { %1671 = vsyncadd [#allocation9], 4294967024  ;;  %v1526_v0 = vld [vmem:[#allocation5] sm:$0xff]   ;;  %v1527_v1 = vld [vmem:[#allocation5 + $0x8] sm:$0xff]   ;;  %vm205_vm0 = vcmask 261120   ;;  %s1683_s4 = smov [#allocation11]  }
  0x5d   :  { %1380 = vmatprep.subr.bf16.mxu0 %v1526_v0  ;;  %v1777_v2 = vld [vmem:[#allocation2] sm:$0xff]  ;;  %v1779_v3 = vld [vmem:[#allocation2 + $0x8] sm:$0xff]  ;;  %v1783_v5 = vld [vmem:[#allocation2 + $0x10] sm:$0xff]  ;;  %s1228_s30 = sshll.u32 %s1683_s4, 4  ;;  %s1229_s30 = int_to_ptr.vmem [resolvable:$true] %s1228_s30 }
  0x5e   :  { %1381 = vmatpush3.bf16.msra.mxu0 %v1526_v0  ;;  %v150_v4 = vpack.c.bf16 %v1779_v3, %v1777_v2  ;;  %v1785_v6 = vld [vmem:[#allocation2 + $0x18] sm:$0xff]  ;;  %v1787_v7 = vld [vmem:[#allocation2 + $0x20] sm:$0xff]  ;;  %v1789_v8 = vld [vmem:[#allocation2 + $0x28] sm:$0xff]  ;;  %s1644_s6 = scalar_lea.vmem %s1229_s30, 8192  ;;  %p1649_p13 = scmp.lt.s32.totalorder %s1229_s30, %s1229_s30 }
  0x5f   :  { %1382 = vmatprep.subr.bf16.mxu0 %v1527_v1  ;;  %v151_v9 = vpack.c.bf16 %v1785_v6, %v1783_v5  ;;  %v152_v10 = vpack.c.bf16 %v1789_v8, %v1787_v7  ;;  %v1798_v11 = vld [vmem:[#allocation2 + $0x30] sm:$0xff]  ;;  %v1800_v12 = vld [vmem:[#allocation2 + $0x38] sm:$0xff]  ;;  %v1802_v13 = vld [vmem:[#allocation2 + $0x40] sm:$0xff]  ;;  %p1645_p12 = scmp.ne.s32.totalorder %s1229_s30, %s1644_s6  ;;  %p1650_p0 = scmp.lt.s32.totalorder %s1644_s6, %s1644_s6 }
  0x60   :  { %1384 = vmatprep.mubr.msk.bf16.mxu0 %vm205_vm0, %v150_v4  ;;  %v1804_v14 = vld [vmem:[#allocation2 + $0x48] sm:$0xff]  ;;  %v153_v15 = vpack.c.bf16 %v1800_v12, %v1798_v11  ;;  %v1812_v17 = vld [vmem:[#allocation2 + $0x50] sm:$0xff]  ;;  %v1814_v18 = vld [vmem:[#allocation2 + $0x58] sm:$0xff] }
  0x61   :  { %v154_v16 = vpack.c.bf16 %v1804_v14, %v1802_v13  ;;  %v1816_v19 = vld [vmem:[#allocation2 + $0x60] sm:$0xff]  ;;  %v1818_v20 = vld [vmem:[#allocation2 + $0x68] sm:$0xff]  ;;  %v155_v21 = vpack.c.bf16 %v1814_v18, %v1812_v17  ;;  %v1826_v23 = vld [vmem:[#allocation2 + $0x70] sm:$0xff]  ;;  %p1651_p1 = por %p1650_p0, %p1649_p13 }
  0x62   :  { %1383 = vmatpush3.bf16.msra.mxu0 %v1527_v1  ;;  %v156_v22 = vpack.c.bf16 %v1818_v20, %v1816_v19  ;;  %v1828_v24 = vld [vmem:[#allocation2 + $0x78] sm:$0xff]  ;;  %v1830_v25 = vld [vmem:[#allocation2 + $0x80] sm:$0xff]  ;;  %v1832_v26 = vld [vmem:[#allocation2 + $0x88] sm:$0xff] }
  0x63   :  { %v157_v27 = vpack.c.bf16 %v1828_v24, %v1826_v23  ;;  %v158_v28 = vpack.c.bf16 %v1832_v26, %v1830_v25  ;;  %v1840_v29 = vld [vmem:[#allocation2 + $0x90] sm:$0xff]  ;;  %v1842_v30 = vld [vmem:[#allocation2 + $0x98] sm:$0xff]  ;;  %v1844_v31 = vld [vmem:[#allocation2 + $0xa0] sm:$0xff]  ;;  %p1652_p2 = pnand %p1651_p1, %p1645_p12 }
  0x64   :  { %v1846_v32 = vld [vmem:[#allocation2 + $0xa8] sm:$0xff]  ;;  %v159_v33 = vpack.c.bf16 %v1842_v30, %v1840_v29  ;;  %v1854_v35 = vld [vmem:[#allocation2 + $0xb0] sm:$0xff]  ;;  %v1856_v36 = vld [vmem:[#allocation2 + $0xb8] sm:$0xff] }
  0x65   :  { %1385 = vmatmul.mubr.msk.bf16.vlgmr.msra.gmra.mrb[0].mxu0 %vm205_vm0, %v151_v9  ;;  %v160_v34 = vpack.c.bf16 %v1846_v32, %v1844_v31  ;;  %v1858_v37 = vld [vmem:[#allocation2 + $0xc0] sm:$0xff]  ;;  %v1860_v38 = vld [vmem:[#allocation2 + $0xc8] sm:$0xff]  ;;  %v161_v39 = vpack.c.bf16 %v1856_v36, %v1854_v35  ;;  %v1868_v41 = vld [vmem:[#allocation2 + $0xd0] sm:$0xff] }
  0x66   :  { %1388 = vmatprep.mubr.msk.bf16.mxu0 %vm205_vm0, %v152_v10  ;;  %v162_v40 = vpack.c.bf16 %v1860_v38, %v1858_v37  ;;  %v1870_v42 = vld [vmem:[#allocation2 + $0xd8] sm:$0xff]  ;;  %v1872_v43 = vld [vmem:[#allocation2 + $0xe0] sm:$0xff]  ;;  %v1874_v44 = vld [vmem:[#allocation2 + $0xe8] sm:$0xff] }
  0x67   :  { %v163_v45 = vpack.c.bf16 %v1870_v42, %v1868_v41  ;;  %v164_v46 = vpack.c.bf16 %v1874_v44, %v1872_v43  ;;  %v1882_v47 = vld [vmem:[#allocation2 + $0xf0] sm:$0xff]  ;;  %v1884_v48 = vld [vmem:[#allocation2 + $0xf8] sm:$0xff]  ;;  %v1886_v49 = vld [vmem:[#allocation2 + $0x100] sm:$0xff] }
  0x68   :  { %v1888_v50 = vld [vmem:[#allocation2 + $0x108] sm:$0xff]  ;;  %v165_v51 = vpack.c.bf16 %v1884_v48, %v1882_v47  ;;  %v1896_v53 = vld [vmem:[#allocation2 + $0x110] sm:$0xff]  ;;  %v1898_v54 = vld [vmem:[#allocation2 + $0x118] sm:$0xff] }
  0x69   :  { %v166_v52 = vpack.c.bf16 %v1888_v50, %v1886_v49  ;;  %v1900_v55 = vld [vmem:[#allocation2 + $0x120] sm:$0xff]  ;;  %v1902_v56 = vld [vmem:[#allocation2 + $0x128] sm:$0xff]  ;;  %v167_v57 = vpack.c.bf16 %v1898_v54, %v1896_v53  ;;  %v1910_v59 = vld [vmem:[#allocation2 + $0x130] sm:$0xff] }
  0x6a   :  { %v168_v58 = vpack.c.bf16 %v1902_v56, %v1900_v55  ;;  %v1912_v60 = vld [vmem:[#allocation2 + $0x138] sm:$0xff]  ;;  %v1914_v61 = vld [vmem:[#allocation2 + $0x140] sm:$0xff]  ;;  %v1916_v62 = vld [vmem:[#allocation2 + $0x148] sm:$0xff] }
  0x6b   :  { %v169_v63 = vpack.c.bf16 %v1912_v60, %v1910_v59  ;;  %v170_v0 = vpack.c.bf16 %v1916_v62, %v1914_v61  ;;  %v1924_v1 = vld [vmem:[#allocation2 + $0x150] sm:$0xff]  ;;  %v1926_v4 = vld [vmem:[#allocation2 + $0x158] sm:$0xff]  ;;  %v1928_v9 = vld [vmem:[#allocation2 + $0x160] sm:$0xff] }
  0x6c   :  { %2313 = vst [vmem:[#allocation16_spill] sm:$0xff] %v1928_v9  ;;  %v1930_v10 = vld [vmem:[#allocation2 + $0x168] sm:$0xff] }
  0x6d   :  { %1389 = vmatmul.mubr.msk.bf16.gmra.mrb[4].mxu0 %vm205_vm0, %v153_v15  ;;  %2314 = vst [vmem:[#allocation17_spill] sm:$0xff] %v1930_v10  ;;  %v171_v15 = vpack.c.bf16 %v1926_v4, %v1924_v1 }
  0x6e   :  { %1392 = vmatprep.mubr.msk.bf16.mxu0 %vm205_vm0, %v154_v16  ;;  %v172_v16 = vpack.c.bf16 %v1930_v10, %v1928_v9 }
  0x75   :  { %1393 = vmatmul.mubr.msk.bf16.gmra.mrb[8].mxu0 %vm205_vm0, %v155_v21  ;;  %v1938_v21 = vld [vmem:[#allocation2 + $0x170] sm:$0xff] }
  0x76   :  { %1396 = vmatprep.mubr.msk.bf16.mxu0 %vm205_vm0, %v156_v22  ;;  %v1940_v22 = vld [vmem:[#allocation2 + $0x178] sm:$0xff] }
  0x77   :  { %2315 = vst [vmem:[#allocation18_spill] sm:$0xff] %v1940_v22 }
  0x7d   :  { %1397 = vmatmul.mubr.msk.bf16.gmra.mrb[12].mxu0 %vm205_vm0, %v157_v27  ;;  %v1942_v27 = vld [vmem:[#allocation2 + $0x180] sm:$0xff] }
  0x7e   :  { %1400 = vmatprep.mubr.msk.bf16.mxu0 %vm205_vm0, %v158_v28  ;;  %2316 = vst [vmem:[#allocation19_spill] sm:$0xff] %v1942_v27  ;;  %v1944_v28 = vld [vmem:[#allocation2 + $0x188] sm:$0xff] }
  0x7f   :  { %2317 = vst [vmem:[#allocation20_spill] sm:$0xff] %v1944_v28 }
  0x85   :  { %1401 = vmatmul.mubr.msk.bf16.gmra.mrb[16].mxu0 %vm205_vm0, %v159_v33  ;;  %v173_v33 = vpack.c.bf16 %v1940_v22, %v1938_v21 }
  0x86   :  { %1404 = vmatprep.mubr.msk.bf16.mxu0 %vm205_vm0, %v160_v34  ;;  %v1528_v34 = vld [vmem:[#allocation8] sm:$0xff]  }
  0x87   :  { %1448 = vmatprep.subr.bf16.mxu1 %v1528_v34 }
  0x88   :  { %1449 = vmatpush3.bf16.msra.mxu1 %v1528_v34 }
  0x8d   :  { %1405 = vmatmul.mubr.msk.bf16.gmra.mrb[20].mxu0 %vm205_vm0, %v161_v39  ;;  %v174_v39 = vpack.c.bf16 %v1944_v28, %v1942_v27 }
  0x8e   :  { %1408 = vmatprep.mubr.msk.bf16.mxu0 %vm205_vm0, %v162_v40  ;;  %v1529_v40 = vld [vmem:[#allocation8 + $0x8] sm:$0xff]  }
  0x8f   :  { %1450 = vmatprep.subr.bf16.mxu1 %v1529_v40 }
  0x90   :  { %1451 = vmatpush3.bf16.msra.mxu1 %v1529_v40  ;;  %v1979_v40 = vld [vmem:[#allocation2 + $0x1d8] sm:$0xff] }
  0x91   :  { %2326 = vst [vmem:[#allocation29_spill] sm:$0xff] %v1979_v40 }
  0x95   :  { %1409 = vmatmul.mubr.msk.bf16.gmra.mrb[24].mxu0 %vm205_vm0, %v163_v45  ;;  %v1952_v45 = vld [vmem:[#allocation2 + $0x190] sm:$0xff] }
  0x96   :  { %1412 = vmatprep.mubr.msk.bf16.mxu0 %vm205_vm0, %v164_v46  ;;  %2318 = vst [vmem:[#allocation21_spill] sm:$0xff] %v1952_v45  ;;  %v1954_v46 = vld [vmem:[#allocation2 + $0x198] sm:$0xff] }
  0x97   :  { %2319 = vst [vmem:[#allocation22_spill] sm:$0xff] %v1954_v46 }
  0x9d   :  { %1413 = vmatmul.mubr.msk.bf16.gmra.mrb[28].mxu0 %vm205_vm0, %v165_v51  ;;  %v1956_v51 = vld [vmem:[#allocation2 + $0x1a0] sm:$0xff] }
  0x9e   :  { %1416 = vmatprep.mubr.msk.bf16.mxu0 %vm205_vm0, %v166_v52  ;;  %2320 = vst [vmem:[#allocation23_spill] sm:$0xff] %v1956_v51  ;;  %v1958_v52 = vld [vmem:[#allocation2 + $0x1a8] sm:$0xff] }
  0x9f   :  { %2321 = vst [vmem:[#allocation24_spill] sm:$0xff] %v1958_v52 }
  0xa5   :  { %1417 = vmatmul.mubr.msk.bf16.gmra.mrb[32].mxu0 %vm205_vm0, %v167_v57  ;;  %v175_v57 = vpack.c.bf16 %v1954_v46, %v1952_v45 }
  0xa6   :  { %1420 = vmatprep.mubr.msk.bf16.mxu0 %vm205_vm0, %v168_v58  ;;  %v176_v58 = vpack.c.bf16 %v1958_v52, %v1956_v51 }
  0xad   :  { %1421 = vmatmul.mubr.msk.bf16.gmra.mrb[36].mxu0 %vm205_vm0, %v169_v63  ;;  %v1966_v63 = vld [vmem:[#allocation2 + $0x1b0] sm:$0xff] }
  0xae   :  { %1424 = vmatprep.mubr.msk.bf16.mxu0 %vm205_vm0, %v170_v0  ;;  %2322 = vst [vmem:[#allocation25_spill] sm:$0xff] %v1966_v63  ;;  %v1968_v0 = vld [vmem:[#allocation2 + $0x1b8] sm:$0xff] }
  0xaf   :  { %2323 = vst [vmem:[#allocation26_spill] sm:$0xff] %v1968_v0 }
  0xb5   :  { %1425 = vmatmul.mubr.msk.bf16.gmra.mrb[40].mxu0 %vm205_vm0, %v171_v15  ;;  %v1970_v15 = vld [vmem:[#allocation2 + $0x1c0] sm:$0xff] }
  0xb6   :  { %1428 = vmatprep.mubr.msk.bf16.mxu0 %vm205_vm0, %v172_v16  ;;  %2324 = vst [vmem:[#allocation27_spill] sm:$0xff] %v1970_v15  ;;  %v143_v16 = vld [vmem:[#allocation2 + $0x1c8] sm:$0xff] }
  0xb7   :  { %v178_v34 = vpack.c.bf16 %v143_v16, %v1970_v15  ;;  %v149_v16 = vld [vmem:[#allocation2 + $0x1f8] sm:$0xff] }
  0xbd   :  { %1429 = vmatmul.mubr.msk.bf16.gmra.mrb[44].mxu0 %vm205_vm0, %v173_v33  ;;  %v177_v33 = vpack.c.bf16 %v1968_v0, %v1966_v63  ;;  %v1985_v0 = vld [vmem:[#allocation2 + $0x1f0] sm:$0xff] }
  0xbe   :  { %1432 = vmatprep.mubr.msk.bf16.mxu0 %vm205_vm0, %v174_v39  ;;  %v1977_v39 = vld [vmem:[#allocation2 + $0x1d0] sm:$0xff]  ;;  %2327 = vst [vmem:[#allocation30_spill] sm:$0xff] %v1985_v0 }
  0xbf   :  { %2325 = vst [vmem:[#allocation28_spill] sm:$0xff] %v1977_v39  ;;  %v179_v52 = vpack.c.bf16 %v1979_v40, %v1977_v39 }
  0xc5   :  { %1433 = vmatmul.mubr.msk.bf16.gmra.mrb[48].mxu0 %vm205_vm0, %v175_v57  ;;  %v146_v57 = vld [vmem:[#allocation2 + $0x1e0] sm:$0xff] }
  0xc6   :  { %1436 = vmatprep.mubr.msk.bf16.mxu0 %vm205_vm0, %v176_v58  ;;  %v147_v58 = vld [vmem:[#allocation2 + $0x1e8] sm:$0xff] }
  0xc7   :  { %v180_v51 = vpack.c.bf16 %v147_v58, %v146_v57 }
  0xcd   :  { %1437 = vmatmul.mubr.msk.bf16.gmra.mrb[52].mxu0 %vm205_vm0, %v177_v33  ;;  %v181_v33 = vpack.c.bf16 %v149_v16, %v1985_v0 }
  0xce   :  { %1440 = vmatprep.mubr.msk.bf16.mxu0 %vm205_vm0, %v178_v34  ;;  %v1989_v34 = vld [vmem:[#allocation7] ss:$0 sm:$0xff] }
  0xd5   :  { %1441 = vmatmul.mubr.msk.bf16.gmra.mrb[56].mxu0 %vm205_vm0, %v179_v52 }
  0xd6   :  { %1444 = vmatprep.mubr.msk.bf16.mxu0 %vm205_vm0, %v180_v51 }
  0xdd   :  { %1445 = vmatmul.mubr.msk.bf16.gmra.mrb[60].mxu0 %vm205_vm0, %v181_v33 }
 0x138   :  { %v1386_v15 = vpop.f32.mrb[0].mxu0 }
 0x139   :  { %v345_v63 = vadd.f32 %v1386_v15, %v1989_v34  ;;  %v336_v28 = vpop.f32.mrb[1].mxu0 }
 0x13a   :  { %v337_v40 = vadd.f32 %v1989_v34, %v336_v28  ;;  %v1387_v57 = vpop.f32.mrb[2].mxu0 }
 0x13b   :  { %v348_v52 = vadd.f32 %v1387_v57, %v1989_v34  ;;  %v339_v58 = vpop.f32.mrb[3].mxu0  ;;  %v593_v39 = vmax.f32 %v345_v63, 0.0 }
 0x13c   :  { %v340_v51 = vadd.f32 %v1989_v34, %v339_v58  ;;  %v591_v27 = vmax.f32 %v337_v40, 0.0 }
 0x13d   :  { %v594_v46 = vmax.f32 %v348_v52, 0.0 }
 0x13e   :  { %v592_v16 = vmax.f32 %v340_v51, 0.0 }
 0x13f   :  { %v656_v0 = vpack.c.bf16 %v594_v46, %v593_v39 }
 0x140   :  { %v1390_v33 = vpop.f32.mrb[4].mxu0  ;;  %v655_v45 = vpack.c.bf16 %v592_v16, %v591_v27 }
 0x141   :  { %v361_v10 = vadd.f32 %v1390_v33, %v1989_v34  ;;  %v352_v22 = vpop.f32.mrb[5].mxu0 }
 0x142   :  { %v353_v15 = vadd.f32 %v1989_v34, %v352_v22  ;;  %v1391_v9 = vpop.f32.mrb[6].mxu0  ;;  %1452 = vmatprep.mubr.msk.bf16.mxu1 %vm205_vm0, %v655_v45 }
 0x143   :  { %v364_v28 = vadd.f32 %v1391_v9, %v1989_v34  ;;  %v355_v57 = vpop.f32.mrb[7].mxu0  ;;  %1453 = vmatmul.mubr.msk.bf16.vlgmr.msra.gmra.mrb[0].mxu1 %vm205_vm0, %v656_v0  ;;  %v597_v40 = vmax.f32 %v361_v10, 0.0 }
 0x144   :  { %v356_v63 = vadd.f32 %v1989_v34, %v355_v57  ;;  %v595_v46 = vmax.f32 %v353_v15, 0.0 }
 0x145   :  { %v598_v52 = vmax.f32 %v364_v28, 0.0 }
 0x146   :  { %v596_v39 = vmax.f32 %v356_v63, 0.0 }
 0x147   :  { %v658_v27 = vpack.c.bf16 %v598_v52, %v597_v40 }
 0x148   :  { %v657_v58 = vpack.c.bf16 %v596_v39, %v595_v46  ;;  %v1394_v51 = vpop.f32.mrb[8].mxu0 }
 0x149   :  { %v377_v16 = vadd.f32 %v1394_v51, %v1989_v34  ;;  %v368_v22 = vpop.f32.mrb[9].mxu0 }
 0x14a   :  { %v369_v33 = vadd.f32 %v1989_v34, %v368_v22  ;;  %v1395_v45 = vpop.f32.mrb[10].mxu0  ;;  %1456 = vmatprep.mubr.msk.bf16.mxu1 %vm205_vm0, %v657_v58 }
 0x14b   :  { %v380_v9 = vadd.f32 %v1395_v45, %v1989_v34  ;;  %v371_v0 = vpop.f32.mrb[11].mxu0  ;;  %1457 = vmatmul.mubr.msk.bf16.gmra.mrb[4].mxu1 %vm205_vm0, %v658_v27  ;;  %v601_v15 = vmax.f32 %v377_v16, 0.0 }
 0x14c   :  { %v372_v10 = vadd.f32 %v1989_v34, %v371_v0  ;;  %v599_v57 = vmax.f32 %v369_v33, 0.0 }
 0x14d   :  { %v602_v28 = vmax.f32 %v380_v9, 0.0 }
 0x14e   :  { %v600_v63 = vmax.f32 %v372_v10, 0.0 }
 0x14f   :  { %v660_v40 = vpack.c.bf16 %v602_v28, %v601_v15 }
 0x150   :  { %v659_v52 = vpack.c.bf16 %v600_v63, %v599_v57  ;;  %v1398_v46 = vpop.f32.mrb[12].mxu0 }
 0x151   :  { %v393_v39 = vadd.f32 %v1398_v46, %v1989_v34  ;;  %v384_v51 = vpop.f32.mrb[13].mxu0 }
 0x152   :  { %v385_v22 = vadd.f32 %v1989_v34, %v384_v51  ;;  %v1399_v58 = vpop.f32.mrb[14].mxu0  ;;  %1460 = vmatprep.mubr.msk.bf16.mxu1 %vm205_vm0, %v659_v52 }
 0x153   :  { %v396_v45 = vadd.f32 %v1399_v58, %v1989_v34  ;;  %v387_v27 = vpop.f32.mrb[15].mxu0  ;;  %1461 = vmatmul.mubr.msk.bf16.gmra.mrb[8].mxu1 %vm205_vm0, %v660_v40  ;;  %v605_v33 = vmax.f32 %v393_v39, 0.0 }
 0x154   :  { %v388_v16 = vadd.f32 %v1989_v34, %v387_v27  ;;  %v603_v0 = vmax.f32 %v385_v22, 0.0 }
 0x155   :  { %v606_v9 = vmax.f32 %v396_v45, 0.0 }
 0x156   :  { %v604_v10 = vmax.f32 %v388_v16, 0.0 }
 0x157   :  { %v662_v15 = vpack.c.bf16 %v606_v9, %v605_v33 }
 0x158   :  { %v661_v28 = vpack.c.bf16 %v604_v10, %v603_v0  ;;  %v1402_v57 = vpop.f32.mrb[16].mxu0 }
 0x159   :  { %v409_v63 = vadd.f32 %v1402_v57, %v1989_v34  ;;  %v400_v46 = vpop.f32.mrb[17].mxu0 }
 0x15a   :  { %v401_v51 = vadd.f32 %v1989_v34, %v400_v46  ;;  %v1403_v52 = vpop.f32.mrb[18].mxu0  ;;  %1464 = vmatprep.mubr.msk.bf16.mxu1 %vm205_vm0, %v661_v28 }
 0x15b   :  { %v412_v58 = vadd.f32 %v1403_v52, %v1989_v34  ;;  %v403_v40 = vpop.f32.mrb[19].mxu0  ;;  %1465 = vmatmul.mubr.msk.bf16.gmra.mrb[12].mxu1 %vm205_vm0, %v662_v15  ;;  %v609_v22 = vmax.f32 %v409_v63, 0.0 }
 0x15c   :  { %v404_v39 = vadd.f32 %v1989_v34, %v403_v40  ;;  %v607_v27 = vmax.f32 %v401_v51, 0.0 }
 0x15d   :  { %v610_v45 = vmax.f32 %v412_v58, 0.0 }
 0x15e   :  { %v608_v16 = vmax.f32 %v404_v39, 0.0 }
 0x15f   :  { %v664_v33 = vpack.c.bf16 %v610_v45, %v609_v22 }
 0x160   :  { %v663_v9 = vpack.c.bf16 %v608_v16, %v607_v27  ;;  %v1406_v0 = vpop.f32.mrb[20].mxu0 }
 0x161   :  { %v425_v10 = vadd.f32 %v1406_v0, %v1989_v34  ;;  %v416_v57 = vpop.f32.mrb[21].mxu0 }
 0x162   :  { %v417_v46 = vadd.f32 %v1989_v34, %v416_v57  ;;  %v1407_v28 = vpop.f32.mrb[22].mxu0  ;;  %1468 = vmatprep.mubr.msk.bf16.mxu1 %vm205_vm0, %v663_v9 }
 0x163   :  { %v428_v52 = vadd.f32 %v1407_v28, %v1989_v34  ;;  %v419_v15 = vpop.f32.mrb[23].mxu0  ;;  %1469 = vmatmul.mubr.msk.bf16.gmra.mrb[16].mxu1 %vm205_vm0, %v664_v33  ;;  %v613_v51 = vmax.f32 %v425_v10, 0.0 }
 0x164   :  { %v420_v63 = vadd.f32 %v1989_v34, %v419_v15  ;;  %v611_v40 = vmax.f32 %v417_v46, 0.0 }
 0x165   :  { %v614_v58 = vmax.f32 %v428_v52, 0.0 }
 0x166   :  { %v612_v39 = vmax.f32 %v420_v63, 0.0 }
 0x167   :  { %v666_v22 = vpack.c.bf16 %v614_v58, %v613_v51 }
 0x168   :  { %v665_v45 = vpack.c.bf16 %v612_v39, %v611_v40  ;;  %v1410_v27 = vpop.f32.mrb[24].mxu0 }
 0x169   :  { %v441_v16 = vadd.f32 %v1410_v27, %v1989_v34  ;;  %v432_v0 = vpop.f32.mrb[25].mxu0 }
 0x16a   :  { %v433_v57 = vadd.f32 %v1989_v34, %v432_v0  ;;  %v1411_v9 = vpop.f32.mrb[26].mxu0  ;;  %1472 = vmatprep.mubr.msk.bf16.mxu1 %vm205_vm0, %v665_v45 }
 0x16b   :  { %v444_v28 = vadd.f32 %v1411_v9, %v1989_v34  ;;  %v435_v33 = vpop.f32.mrb[27].mxu0  ;;  %1473 = vmatmul.mubr.msk.bf16.gmra.mrb[20].mxu1 %vm205_vm0, %v666_v22  ;;  %v617_v46 = vmax.f32 %v441_v16, 0.0 }
 0x16c   :  { %v436_v10 = vadd.f32 %v1989_v34, %v435_v33  ;;  %v615_v15 = vmax.f32 %v433_v57, 0.0 }
 0x16d   :  { %v618_v52 = vmax.f32 %v444_v28, 0.0 }
 0x16e   :  { %v616_v63 = vmax.f32 %v436_v10, 0.0 }
 0x16f   :  { %v668_v51 = vpack.c.bf16 %v618_v52, %v617_v46 }
 0x170   :  { %v667_v58 = vpack.c.bf16 %v616_v63, %v615_v15  ;;  %v1414_v40 = vpop.f32.mrb[28].mxu0 }
 0x171   :  { %v457_v39 = vadd.f32 %v1414_v40, %v1989_v34  ;;  %v448_v27 = vpop.f32.mrb[29].mxu0 }
 0x172   :  { %v449_v0 = vadd.f32 %v1989_v34, %v448_v27  ;;  %v1415_v45 = vpop.f32.mrb[30].mxu0  ;;  %1476 = vmatprep.mubr.msk.bf16.mxu1 %vm205_vm0, %v667_v58 }
 0x173   :  { %v460_v9 = vadd.f32 %v1415_v45, %v1989_v34  ;;  %v451_v22 = vpop.f32.mrb[31].mxu0  ;;  %1477 = vmatmul.mubr.msk.bf16.gmra.mrb[24].mxu1 %vm205_vm0, %v668_v51  ;;  %v621_v57 = vmax.f32 %v457_v39, 0.0 }
 0x174   :  { %v452_v16 = vadd.f32 %v1989_v34, %v451_v22  ;;  %v619_v33 = vmax.f32 %v449_v0, 0.0 }
 0x175   :  { %v622_v28 = vmax.f32 %v460_v9, 0.0 }
 0x176   :  { %v620_v10 = vmax.f32 %v452_v16, 0.0 }
 0x177   :  { %v670_v46 = vpack.c.bf16 %v622_v28, %v621_v57 }
 0x178   :  { %v669_v52 = vpack.c.bf16 %v620_v10, %v619_v33  ;;  %v1418_v15 = vpop.f32.mrb[32].mxu0 }
 0x179   :  { %v473_v63 = vadd.f32 %v1418_v15, %v1989_v34  ;;  %v464_v40 = vpop.f32.mrb[33].mxu0 }
 0x17a   :  { %v465_v27 = vadd.f32 %v1989_v34, %v464_v40  ;;  %v1419_v58 = vpop.f32.mrb[34].mxu0  ;;  %1480 = vmatprep.mubr.msk.bf16.mxu1 %vm205_vm0, %v669_v52 }
 0x17b   :  { %v476_v45 = vadd.f32 %v1419_v58, %v1989_v34  ;;  %v467_v51 = vpop.f32.mrb[35].mxu0  ;;  %1481 = vmatmul.mubr.msk.bf16.gmra.mrb[28].mxu1 %vm205_vm0, %v670_v46  ;;  %v625_v0 = vmax.f32 %v473_v63, 0.0 }
 0x17c   :  { %v468_v39 = vadd.f32 %v1989_v34, %v467_v51  ;;  %v623_v22 = vmax.f32 %v465_v27, 0.0 }
 0x17d   :  { %v626_v9 = vmax.f32 %v476_v45, 0.0 }
 0x17e   :  { %v624_v16 = vmax.f32 %v468_v39, 0.0 }
 0x17f   :  { %v672_v57 = vpack.c.bf16 %v626_v9, %v625_v0 }
 0x180   :  { %v671_v28 = vpack.c.bf16 %v624_v16, %v623_v22  ;;  %v1422_v33 = vpop.f32.mrb[36].mxu0 }
 0x181   :  { %v489_v10 = vadd.f32 %v1422_v33, %v1989_v34  ;;  %v480_v15 = vpop.f32.mrb[37].mxu0 }
 0x182   :  { %v481_v40 = vadd.f32 %v1989_v34, %v480_v15  ;;  %v1423_v52 = vpop.f32.mrb[38].mxu0  ;;  %1484 = vmatprep.mubr.msk.bf16.mxu1 %vm205_vm0, %v671_v28 }
 0x183   :  { %v492_v58 = vadd.f32 %v1423_v52, %v1989_v34  ;;  %v483_v46 = vpop.f32.mrb[39].mxu0  ;;  %1485 = vmatmul.mubr.msk.bf16.gmra.mrb[32].mxu1 %vm205_vm0, %v672_v57  ;;  %v629_v27 = vmax.f32 %v489_v10, 0.0 }
 0x184   :  { %v484_v63 = vadd.f32 %v1989_v34, %v483_v46  ;;  %v627_v51 = vmax.f32 %v481_v40, 0.0 }
 0x185   :  { %v630_v45 = vmax.f32 %v492_v58, 0.0 }
 0x186   :  { %v628_v39 = vmax.f32 %v484_v63, 0.0 }
 0x187   :  { %v674_v0 = vpack.c.bf16 %v630_v45, %v629_v27 }
 0x188   :  { %v673_v9 = vpack.c.bf16 %v628_v39, %v627_v51  ;;  %v1426_v22 = vpop.f32.mrb[40].mxu0 }
 0x189   :  { %v505_v16 = vadd.f32 %v1426_v22, %v1989_v34  ;;  %v496_v33 = vpop.f32.mrb[41].mxu0 }
 0x18a   :  { %v497_v15 = vadd.f32 %v1989_v34, %v496_v33  ;;  %v1427_v28 = vpop.f32.mrb[42].mxu0  ;;  %1488 = vmatprep.mubr.msk.bf16.mxu1 %vm205_vm0, %v673_v9 }
 0x18b   :  { %v508_v52 = vadd.f32 %v1427_v28, %v1989_v34  ;;  %v499_v57 = vpop.f32.mrb[43].mxu0  ;;  %1489 = vmatmul.mubr.msk.bf16.gmra.mrb[36].mxu1 %vm205_vm0, %v674_v0  ;;  %v633_v40 = vmax.f32 %v505_v16, 0.0 }
 0x18c   :  { %v500_v10 = vadd.f32 %v1989_v34, %v499_v57  ;;  %v631_v46 = vmax.f32 %v497_v15, 0.0 }
 0x18d   :  { %v634_v58 = vmax.f32 %v508_v52, 0.0 }
 0x18e   :  { %v632_v63 = vmax.f32 %v500_v10, 0.0 }
 0x18f   :  { %v676_v27 = vpack.c.bf16 %v634_v58, %v633_v40 }
 0x190   :  { %v675_v45 = vpack.c.bf16 %v632_v63, %v631_v46  ;;  %v1430_v51 = vpop.f32.mrb[44].mxu0 }
 0x191   :  { %v521_v39 = vadd.f32 %v1430_v51, %v1989_v34  ;;  %v512_v22 = vpop.f32.mrb[45].mxu0 }
 0x192   :  { %v513_v33 = vadd.f32 %v1989_v34, %v512_v22  ;;  %v1431_v9 = vpop.f32.mrb[46].mxu0  ;;  %1492 = vmatprep.mubr.msk.bf16.mxu1 %vm205_vm0, %v675_v45 }
 0x193   :  { %v524_v28 = vadd.f32 %v1431_v9, %v1989_v34  ;;  %v515_v0 = vpop.f32.mrb[47].mxu0  ;;  %1493 = vmatmul.mubr.msk.bf16.gmra.mrb[40].mxu1 %vm205_vm0, %v676_v27  ;;  %v637_v15 = vmax.f32 %v521_v39, 0.0 }
 0x194   :  { %v516_v16 = vadd.f32 %v1989_v34, %v515_v0  ;;  %v635_v57 = vmax.f32 %v513_v33, 0.0 }
 0x195   :  { %v638_v52 = vmax.f32 %v524_v28, 0.0 }
 0x196   :  { %v636_v10 = vmax.f32 %v516_v16, 0.0 }
 0x197   :  { %v678_v40 = vpack.c.bf16 %v638_v52, %v637_v15 }
 0x198   :  { %v677_v58 = vpack.c.bf16 %v636_v10, %v635_v57  ;;  %v1434_v46 = vpop.f32.mrb[48].mxu0 }
 0x199   :  { %v537_v63 = vadd.f32 %v1434_v46, %v1989_v34  ;;  %v528_v51 = vpop.f32.mrb[49].mxu0 }
 0x19a   :  { %v529_v22 = vadd.f32 %v1989_v34, %v528_v51  ;;  %v1435_v45 = vpop.f32.mrb[50].mxu0  ;;  %1496 = vmatprep.mubr.msk.bf16.mxu1 %vm205_vm0, %v677_v58 }
 0x19b   :  { %v540_v9 = vadd.f32 %v1435_v45, %v1989_v34  ;;  %v531_v27 = vpop.f32.mrb[51].mxu0  ;;  %1497 = vmatmul.mubr.msk.bf16.gmra.mrb[44].mxu1 %vm205_vm0, %v678_v40  ;;  %v641_v33 = vmax.f32 %v537_v63, 0.0 }
 0x19c   :  { %v532_v39 = vadd.f32 %v1989_v34, %v531_v27  ;;  %v639_v0 = vmax.f32 %v529_v22, 0.0 }
 0x19d   :  { %v642_v28 = vmax.f32 %v540_v9, 0.0 }
 0x19e   :  { %v640_v16 = vmax.f32 %v532_v39, 0.0 }
 0x19f   :  { %v680_v15 = vpack.c.bf16 %v642_v28, %v641_v33 }
 0x1a0   :  { %v679_v52 = vpack.c.bf16 %v640_v16, %v639_v0  ;;  %v1438_v57 = vpop.f32.mrb[52].mxu0 }
 0x1a1   :  { %v553_v10 = vadd.f32 %v1438_v57, %v1989_v34  ;;  %v544_v46 = vpop.f32.mrb[53].mxu0 }
 0x1a2   :  { %v545_v51 = vadd.f32 %v1989_v34, %v544_v46  ;;  %v1439_v58 = vpop.f32.mrb[54].mxu0  ;;  %1500 = vmatprep.mubr.msk.bf16.mxu1 %vm205_vm0, %v679_v52 }
 0x1a3   :  { %v556_v45 = vadd.f32 %v1439_v58, %v1989_v34  ;;  %v547_v40 = vpop.f32.mrb[55].mxu0  ;;  %1501 = vmatmul.mubr.msk.bf16.gmra.mrb[48].mxu1 %vm205_vm0, %v680_v15  ;;  %v645_v22 = vmax.f32 %v553_v10, 0.0 }
 0x1a4   :  { %v548_v63 = vadd.f32 %v1989_v34, %v547_v40  ;;  %v643_v27 = vmax.f32 %v545_v51, 0.0 }
 0x1a5   :  { %v646_v9 = vmax.f32 %v556_v45, 0.0 }
 0x1a6   :  { %v644_v39 = vmax.f32 %v548_v63, 0.0 }
 0x1a7   :  { %v682_v33 = vpack.c.bf16 %v646_v9, %v645_v22 }
 0x1a8   :  { %v681_v28 = vpack.c.bf16 %v644_v39, %v643_v27  ;;  %v1442_v0 = vpop.f32.mrb[56].mxu0 }
 0x1a9   :  { %v569_v16 = vadd.f32 %v1442_v0, %v1989_v34  ;;  %v560_v57 = vpop.f32.mrb[57].mxu0 }
 0x1aa   :  { %v561_v46 = vadd.f32 %v1989_v34, %v560_v57  ;;  %v1443_v52 = vpop.f32.mrb[58].mxu0  ;;  %1504 = vmatprep.mubr.msk.bf16.mxu1 %vm205_vm0, %v681_v28 }
 0x1ab   :  { %v572_v58 = vadd.f32 %v1443_v52, %v1989_v34  ;;  %v563_v15 = vpop.f32.mrb[59].mxu0  ;;  %1505 = vmatmul.mubr.msk.bf16.gmra.mrb[52].mxu1 %vm205_vm0, %v682_v33  ;;  %v649_v51 = vmax.f32 %v569_v16, 0.0 }
 0x1ac   :  { %v564_v10 = vadd.f32 %v1989_v34, %v563_v15  ;;  %v647_v40 = vmax.f32 %v561_v46, 0.0 }
 0x1ad   :  { %v650_v45 = vmax.f32 %v572_v58, 0.0 }
 0x1ae   :  { %v648_v63 = vmax.f32 %v564_v10, 0.0 }
 0x1af   :  { %v684_v22 = vpack.c.bf16 %v650_v45, %v649_v51 }
 0x1b0   :  { %v683_v9 = vpack.c.bf16 %v648_v63, %v647_v40  ;;  %v1446_v27 = vpop.f32.mrb[60].mxu0  ;;  %v2087_v40 = vld [vmem:[#allocation10] ss:$0 sm:$0xff] }
 0x1b1   :  { %v585_v39 = vadd.f32 %v1446_v27, %v1989_v34  ;;  %v576_v0 = vpop.f32.mrb[61].mxu0 }
 0x1b2   :  { %v577_v57 = vadd.f32 %v1989_v34, %v576_v0  ;;  %v1447_v28 = vpop.f32.mrb[62].mxu0  ;;  %1508 = vmatprep.mubr.msk.bf16.mxu1 %vm205_vm0, %v683_v9 }
 0x1b3   :  { %v588_v52 = vadd.f32 %v1447_v28, %v1989_v34  ;;  %v579_v33 = vpop.f32.mrb[63].mxu0  ;;  %1509 = vmatmul.mubr.msk.bf16.gmra.mrb[56].mxu1 %vm205_vm0, %v684_v22  ;;  %v653_v46 = vmax.f32 %v585_v39, 0.0 }
 0x1b4   :  { %v580_v16 = vadd.f32 %v1989_v34, %v579_v33  ;;  %v651_v15 = vmax.f32 %v577_v57, 0.0 }
 0x1b5   :  { %v654_v58 = vmax.f32 %v588_v52, 0.0 }
 0x1b6   :  { %v652_v10 = vmax.f32 %v580_v16, 0.0 }
 0x1b7   :  { %v686_v51 = vpack.c.bf16 %v654_v58, %v653_v46 }
 0x1b8   :  { %v685_v45 = vpack.c.bf16 %v652_v10, %v651_v15 }
 0x1ba   :  { %1512 = vmatprep.mubr.msk.bf16.mxu1 %vm205_vm0, %v685_v45 }
 0x1bb   :  { %1513 = vmatmul.mubr.msk.bf16.gmra.mrb[60].mxu1 %vm205_vm0, %v686_v51 }
 0x216   :  { %v1454_v63 = vpop.f32.mrb[0].mxu1 }
 0x217   :  { %v849_v9 = vadd.f32 %v1454_v63, %v2087_v40  ;;  %v840_v27 = vpop.f32.mrb[1].mxu1 }
 0x218   :  { %v841_v22 = vadd.f32 %v2087_v40, %v840_v27  ;;  %v1455_v0 = vpop.f32.mrb[2].mxu1 }
 0x219   :  { %v1097_v34 = vadd.f32 %v849_v9, %v1783_v5  ;;  %v852_v39 = vadd.f32 %v1455_v0, %v2087_v40  ;;  %v843_v57 = vpop.f32.mrb[3].mxu1 }
 0x21a   :  { %v1095_v28 = vadd.f32 %v841_v22, %v1777_v2  ;;  %v844_v52 = vadd.f32 %v2087_v40, %v843_v57 }
 0x21b   :  { %1161 = vst.msk [vmem:[#allocation11 + $0x10] sm:$0xff] %vm205_vm0, %v1097_v34  ;;  %v1098_v33 = vadd.f32 %v852_v39, %v1785_v6 }
 0x21c   :  { %1159 = vst.msk [vmem:[#allocation11] sm:$0xff] %vm205_vm0, %v1095_v28  ;;  %v1096_v16 = vadd.f32 %v844_v52, %v1779_v3 }
 0x21d   :  { %1162 = vst.msk [vmem:[#allocation11 + $0x18] sm:$0xff] %vm205_vm0, %v1098_v33 }
 0x21e   :  { %1160 = vst.msk [vmem:[#allocation11 + $0x8] sm:$0xff] %vm205_vm0, %v1096_v16  ;;  %v1458_v5 = vpop.f32.mrb[4].mxu1 }
 0x21f   :  { %v865_v46 = vadd.f32 %v1458_v5, %v2087_v40  ;;  %v856_v58 = vpop.f32.mrb[5].mxu1 }
 0x220   :  { %v857_v2 = vadd.f32 %v2087_v40, %v856_v58  ;;  %v1459_v15 = vpop.f32.mrb[6].mxu1 }
 0x221   :  { %v1101_v10 = vadd.f32 %v865_v46, %v1798_v11  ;;  %v868_v51 = vadd.f32 %v1459_v15, %v2087_v40  ;;  %v859_v6 = vpop.f32.mrb[7].mxu1 }
 0x222   :  { %v1099_v45 = vadd.f32 %v857_v2, %v1787_v7  ;;  %v860_v3 = vadd.f32 %v2087_v40, %v859_v6 }
 0x223   :  { %1165 = vst.msk [vmem:[#allocation11 + $0x30] sm:$0xff] %vm205_vm0, %v1101_v10  ;;  %v1102_v63 = vadd.f32 %v868_v51, %v1800_v12 }
 0x224   :  { %1163 = vst.msk [vmem:[#allocation11 + $0x20] sm:$0xff] %vm205_vm0, %v1099_v45  ;;  %v1100_v9 = vadd.f32 %v860_v3, %v1789_v8 }
 0x225   :  { %1166 = vst.msk [vmem:[#allocation11 + $0x38] sm:$0xff] %vm205_vm0, %v1102_v63 }
 0x226   :  { %1164 = vst.msk [vmem:[#allocation11 + $0x28] sm:$0xff] %vm205_vm0, %v1100_v9  ;;  %v1462_v11 = vpop.f32.mrb[8].mxu1 }
 0x227   :  { %v881_v27 = vadd.f32 %v1462_v11, %v2087_v40  ;;  %v872_v22 = vpop.f32.mrb[9].mxu1 }
 0x228   :  { %v873_v7 = vadd.f32 %v2087_v40, %v872_v22  ;;  %v1463_v0 = vpop.f32.mrb[10].mxu1 }
 0x229   :  { %v1105_v34 = vadd.f32 %v881_v27, %v1812_v17  ;;  %v884_v39 = vadd.f32 %v1463_v0, %v2087_v40  ;;  %v875_v12 = vpop.f32.mrb[11].mxu1 }
 0x22a   :  { %v1103_v57 = vadd.f32 %v873_v7, %v1802_v13  ;;  %v876_v8 = vadd.f32 %v2087_v40, %v875_v12 }
 0x22b   :  { %1169 = vst.msk [vmem:[#allocation11 + $0x50] sm:$0xff] %vm205_vm0, %v1105_v34  ;;  %v1106_v28 = vadd.f32 %v884_v39, %v1814_v18 }
 0x22c   :  { %1167 = vst.msk [vmem:[#allocation11 + $0x40] sm:$0xff] %vm205_vm0, %v1103_v57  ;;  %v1104_v52 = vadd.f32 %v876_v8, %v1804_v14 }
 0x22d   :  { %1170 = vst.msk [vmem:[#allocation11 + $0x58] sm:$0xff] %vm205_vm0, %v1106_v28 }
 0x22e   :  { %1168 = vst.msk [vmem:[#allocation11 + $0x48] sm:$0xff] %vm205_vm0, %v1104_v52  ;;  %v1466_v17 = vpop.f32.mrb[12].mxu1 }
 0x22f   :  { %v897_v33 = vadd.f32 %v1466_v17, %v2087_v40  ;;  %v888_v16 = vpop.f32.mrb[13].mxu1 }
 0x230   :  { %v889_v13 = vadd.f32 %v2087_v40, %v888_v16  ;;  %v1467_v5 = vpop.f32.mrb[14].mxu1 }
 0x231   :  { %v1109_v46 = vadd.f32 %v897_v33, %v1826_v23  ;;  %v900_v58 = vadd.f32 %v1467_v5, %v2087_v40  ;;  %v891_v18 = vpop.f32.mrb[15].mxu1 }
 0x232   :  { %v1107_v2 = vadd.f32 %v889_v13, %v1816_v19  ;;  %v892_v14 = vadd.f32 %v2087_v40, %v891_v18 }
 0x233   :  { %1173 = vst.msk [vmem:[#allocation11 + $0x70] sm:$0xff] %vm205_vm0, %v1109_v46  ;;  %v1110_v15 = vadd.f32 %v900_v58, %v1828_v24 }
 0x234   :  { %1171 = vst.msk [vmem:[#allocation11 + $0x60] sm:$0xff] %vm205_vm0, %v1107_v2  ;;  %v1108_v10 = vadd.f32 %v892_v14, %v1818_v20 }
 0x235   :  { %1174 = vst.msk [vmem:[#allocation11 + $0x78] sm:$0xff] %vm205_vm0, %v1110_v15 }
 0x236   :  { %1172 = vst.msk [vmem:[#allocation11 + $0x68] sm:$0xff] %vm205_vm0, %v1108_v10  ;;  %v1470_v23 = vpop.f32.mrb[16].mxu1 }
 0x237   :  { %v913_v51 = vadd.f32 %v1470_v23, %v2087_v40  ;;  %v904_v6 = vpop.f32.mrb[17].mxu1 }
 0x238   :  { %v905_v19 = vadd.f32 %v2087_v40, %v904_v6  ;;  %v1471_v45 = vpop.f32.mrb[18].mxu1 }
 0x239   :  { %v1113_v3 = vadd.f32 %v913_v51, %v1840_v29  ;;  %v916_v63 = vadd.f32 %v1471_v45, %v2087_v40  ;;  %v907_v24 = vpop.f32.mrb[19].mxu1 }
 0x23a   :  { %v1111_v9 = vadd.f32 %v905_v19, %v1830_v25  ;;  %v908_v20 = vadd.f32 %v2087_v40, %v907_v24 }
 0x23b   :  { %1177 = vst.msk [vmem:[#allocation11 + $0x90] sm:$0xff] %vm205_vm0, %v1113_v3  ;;  %v1114_v11 = vadd.f32 %v916_v63, %v1842_v30 }
 0x23c   :  { %1175 = vst.msk [vmem:[#allocation11 + $0x80] sm:$0xff] %vm205_vm0, %v1111_v9  ;;  %v1112_v27 = vadd.f32 %v908_v20, %v1832_v26 }
 0x23d   :  { %1178 = vst.msk [vmem:[#allocation11 + $0x98] sm:$0xff] %vm205_vm0, %v1114_v11 }
 0x23e   :  { %1176 = vst.msk [vmem:[#allocation11 + $0x88] sm:$0xff] %vm205_vm0, %v1112_v27  ;;  %v1474_v29 = vpop.f32.mrb[20].mxu1 }
 0x23f   :  { %v929_v22 = vadd.f32 %v1474_v29, %v2087_v40  ;;  %v920_v7 = vpop.f32.mrb[21].mxu1 }
 0x240   :  { %v921_v25 = vadd.f32 %v2087_v40, %v920_v7  ;;  %v1475_v0 = vpop.f32.mrb[22].mxu1 }
 0x241   :  { %v1117_v34 = vadd.f32 %v929_v22, %v1854_v35  ;;  %v932_v39 = vadd.f32 %v1475_v0, %v2087_v40  ;;  %v923_v30 = vpop.f32.mrb[23].mxu1 }
 0x242   :  { %v1115_v12 = vadd.f32 %v921_v25, %v1844_v31  ;;  %v924_v26 = vadd.f32 %v2087_v40, %v923_v30 }
 0x243   :  { %1181 = vst.msk [vmem:[#allocation11 + $0xb0] sm:$0xff] %vm205_vm0, %v1117_v34  ;;  %v1118_v57 = vadd.f32 %v932_v39, %v1856_v36 }
 0x244   :  { %1179 = vst.msk [vmem:[#allocation11 + $0xa0] sm:$0xff] %vm205_vm0, %v1115_v12  ;;  %v1116_v8 = vadd.f32 %v924_v26, %v1846_v32 }
 0x245   :  { %1182 = vst.msk [vmem:[#allocation11 + $0xb8] sm:$0xff] %vm205_vm0, %v1118_v57 }
 0x246   :  { %1180 = vst.msk [vmem:[#allocation11 + $0xa8] sm:$0xff] %vm205_vm0, %v1116_v8  ;;  %v1478_v35 = vpop.f32.mrb[24].mxu1 }
 0x247   :  { %v945_v28 = vadd.f32 %v1478_v35, %v2087_v40  ;;  %v936_v52 = vpop.f32.mrb[25].mxu1 }
 0x248   :  { %v937_v31 = vadd.f32 %v2087_v40, %v936_v52  ;;  %v1479_v17 = vpop.f32.mrb[26].mxu1 }
 0x249   :  { %v1121_v33 = vadd.f32 %v945_v28, %v1868_v41  ;;  %v948_v16 = vadd.f32 %v1479_v17, %v2087_v40  ;;  %v939_v36 = vpop.f32.mrb[27].mxu1 }
 0x24a   :  { %v1119_v13 = vadd.f32 %v937_v31, %v1858_v37  ;;  %v940_v32 = vadd.f32 %v2087_v40, %v939_v36  ;;  %v2328_v36 = vld [vmem:[#allocation16_spill] sm:$0xff] }
 0x24b   :  { %1185 = vst.msk [vmem:[#allocation11 + $0xd0] sm:$0xff] %vm205_vm0, %v1121_v33  ;;  %v1122_v5 = vadd.f32 %v948_v16, %v1870_v42 }
 0x24c   :  { %1183 = vst.msk [vmem:[#allocation11 + $0xc0] sm:$0xff] %vm205_vm0, %v1119_v13  ;;  %v1120_v46 = vadd.f32 %v940_v32, %v1860_v38  ;;  %v2329_v32 = vld [vmem:[#allocation18_spill] sm:$0xff] }
 0x24d   :  { %1186 = vst.msk [vmem:[#allocation11 + $0xd8] sm:$0xff] %vm205_vm0, %v1122_v5 }
 0x24e   :  { %1184 = vst.msk [vmem:[#allocation11 + $0xc8] sm:$0xff] %vm205_vm0, %v1120_v46  ;;  %v1482_v41 = vpop.f32.mrb[28].mxu1  ;;  %v2330_v46 = vld [vmem:[#allocation17_spill] sm:$0xff] }
 0x24f   :  { %v961_v58 = vadd.f32 %v1482_v41, %v2087_v40  ;;  %v952_v18 = vpop.f32.mrb[29].mxu1 }
 0x250   :  { %v953_v37 = vadd.f32 %v2087_v40, %v952_v18  ;;  %v1483_v2 = vpop.f32.mrb[30].mxu1 }
 0x251   :  { %v1125_v14 = vadd.f32 %v961_v58, %v1882_v47  ;;  %v964_v15 = vadd.f32 %v1483_v2, %v2087_v40  ;;  %v955_v42 = vpop.f32.mrb[31].mxu1 }
 0x252   :  { %v1123_v10 = vadd.f32 %v953_v37, %v1872_v43  ;;  %v956_v38 = vadd.f32 %v2087_v40, %v955_v42 }
 0x253   :  { %1189 = vst.msk [vmem:[#allocation11 + $0xf0] sm:$0xff] %vm205_vm0, %v1125_v14  ;;  %v1126_v23 = vadd.f32 %v964_v15, %v1884_v48  ;;  %v2331_v14 = vld [vmem:[#allocation21_spill] sm:$0xff] }
 0x254   :  { %1187 = vst.msk [vmem:[#allocation11 + $0xe0] sm:$0xff] %vm205_vm0, %v1123_v10  ;;  %v1124_v51 = vadd.f32 %v956_v38, %v1874_v44  ;;  %v2332_v38 = vld [vmem:[#allocation19_spill] sm:$0xff] }
 0x255   :  { %1190 = vst.msk [vmem:[#allocation11 + $0xf8] sm:$0xff] %vm205_vm0, %v1126_v23 }
 0x256   :  { %1188 = vst.msk [vmem:[#allocation11 + $0xe8] sm:$0xff] %vm205_vm0, %v1124_v51  ;;  %v1486_v47 = vpop.f32.mrb[32].mxu1 }
 0x257   :  { %v977_v6 = vadd.f32 %v1486_v47, %v2087_v40  ;;  %v968_v19 = vpop.f32.mrb[33].mxu1  ;;  %v2333_v47 = vld [vmem:[#allocation22_spill] sm:$0xff] }
 0x258   :  { %v969_v43 = vadd.f32 %v2087_v40, %v968_v19  ;;  %v1487_v45 = vpop.f32.mrb[34].mxu1  ;;  %v2334_v19 = vld [vmem:[#allocation20_spill] sm:$0xff] }
 0x259   :  { %v1129_v3 = vadd.f32 %v977_v6, %v1896_v53  ;;  %v980_v63 = vadd.f32 %v1487_v45, %v2087_v40  ;;  %v971_v48 = vpop.f32.mrb[35].mxu1 }
 0x25a   :  { %v1127_v24 = vadd.f32 %v969_v43, %v1886_v49  ;;  %v972_v44 = vadd.f32 %v2087_v40, %v971_v48 }
 0x25b   :  { %1193 = vst.msk [vmem:[#allocation11 + $0x110] sm:$0xff] %vm205_vm0, %v1129_v3  ;;  %v1130_v9 = vadd.f32 %v980_v63, %v1898_v54 }
 0x25c   :  { %1191 = vst.msk [vmem:[#allocation11 + $0x100] sm:$0xff] %vm205_vm0, %v1127_v24  ;;  %v1128_v20 = vadd.f32 %v972_v44, %v1888_v50  ;;  %v2335_v44 = vld [vmem:[#allocation25_spill] sm:$0xff] }
 0x25d   :  { %1194 = vst.msk [vmem:[#allocation11 + $0x118] sm:$0xff] %vm205_vm0, %v1130_v9 }
 0x25e   :  { %1192 = vst.msk [vmem:[#allocation11 + $0x108] sm:$0xff] %vm205_vm0, %v1128_v20  ;;  %v1490_v53 = vpop.f32.mrb[36].mxu1 }
 0x25f   :  { %v993_v11 = vadd.f32 %v1490_v53, %v2087_v40  ;;  %v984_v27 = vpop.f32.mrb[37].mxu1 }
 0x260   :  { %v985_v49 = vadd.f32 %v2087_v40, %v984_v27  ;;  %v1491_v29 = vpop.f32.mrb[38].mxu1 }
 0x261   :  { %v1133_v22 = vadd.f32 %v993_v11, %v1910_v59  ;;  %v996_v7 = vadd.f32 %v1491_v29, %v2087_v40  ;;  %v987_v54 = vpop.f32.mrb[39].mxu1  ;;  %v2336_v11 = vld [vmem:[#allocation23_spill] sm:$0xff]  ;;  %v2337_v29 = vld [vmem:[#allocation26_spill] sm:$0xff] }
 0x262   :  { %v1131_v25 = vadd.f32 %v985_v49, %v1900_v55  ;;  %v988_v50 = vadd.f32 %v2087_v40, %v987_v54 }
 0x263   :  { %1197 = vst.msk [vmem:[#allocation11 + $0x130] sm:$0xff] %vm205_vm0, %v1133_v22  ;;  %v1134_v0 = vadd.f32 %v996_v7, %v1912_v60  ;;  %v2338_v7 = vld [vmem:[#allocation24_spill] sm:$0xff] }
 0x264   :  { %1195 = vst.msk [vmem:[#allocation11 + $0x120] sm:$0xff] %vm205_vm0, %v1131_v25  ;;  %v1132_v34 = vadd.f32 %v988_v50, %v1902_v56 }
 0x265   :  { %1198 = vst.msk [vmem:[#allocation11 + $0x138] sm:$0xff] %vm205_vm0, %v1134_v0 }
 0x266   :  { %1196 = vst.msk [vmem:[#allocation11 + $0x128] sm:$0xff] %vm205_vm0, %v1132_v34  ;;  %v1494_v59 = vpop.f32.mrb[40].mxu1 }
 0x267   :  { %v1009_v39 = vadd.f32 %v1494_v59, %v2087_v40  ;;  %v1000_v30 = vpop.f32.mrb[41].mxu1 }
 0x268   :  { %v1001_v55 = vadd.f32 %v2087_v40, %v1000_v30  ;;  %v1495_v12 = vpop.f32.mrb[42].mxu1 }
 0x269   :  { %v1137_v26 = vadd.f32 %v1009_v39, %v1924_v1  ;;  %v1012_v57 = vadd.f32 %v1495_v12, %v2087_v40  ;;  %v1003_v60 = vpop.f32.mrb[43].mxu1  ;;  %v2339_v39 = vld [vmem:[#allocation28_spill] sm:$0xff] }
 0x26a   :  { %v1135_v8 = vadd.f32 %v1001_v55, %v1914_v61  ;;  %v1004_v56 = vadd.f32 %v2087_v40, %v1003_v60 }
 0x26b   :  { %1201 = vst.msk [vmem:[#allocation11 + $0x150] sm:$0xff] %vm205_vm0, %v1137_v26  ;;  %v1138_v35 = vadd.f32 %v1012_v57, %v1926_v4  ;;  %v2340_v26 = vld [vmem:[#allocation27_spill] sm:$0xff] }
 0x26c   :  { %1199 = vst.msk [vmem:[#allocation11 + $0x140] sm:$0xff] %vm205_vm0, %v1135_v8  ;;  %v1136_v28 = vadd.f32 %v1004_v56, %v1916_v62  ;;  %v2341_v8 = vld [vmem:[#allocation29_spill] sm:$0xff] }
 0x26d   :  { %1202 = vst.msk [vmem:[#allocation11 + $0x158] sm:$0xff] %vm205_vm0, %v1138_v35  ;;  %v1530_v35 = vld [vmem:[#allocation2 + $0x1c8] sm:$0xff] }
 0x26e   :  { %1200 = vst.msk [vmem:[#allocation11 + $0x148] sm:$0xff] %vm205_vm0, %v1136_v28  ;;  %v1498_v1 = vpop.f32.mrb[44].mxu1 }
 0x26f   :  { %v1025_v52 = vadd.f32 %v1498_v1, %v2087_v40  ;;  %v1016_v31 = vpop.f32.mrb[45].mxu1 }
 0x270   :  { %v1017_v61 = vadd.f32 %v2087_v40, %v1016_v31  ;;  %v1499_v17 = vpop.f32.mrb[46].mxu1 }
 0x271   :  { %v1141_v33 = vadd.f32 %v1025_v52, %v1938_v21  ;;  %v1028_v16 = vadd.f32 %v1499_v17, %v2087_v40  ;;  %v1019_v4 = vpop.f32.mrb[47].mxu1 }
 0x272   :  { %v1139_v13 = vadd.f32 %v1017_v61, %v2328_v36  ;;  %v1020_v62 = vadd.f32 %v2087_v40, %v1019_v4 }
 0x273   :  { %1205 = vst.msk [vmem:[#allocation11 + $0x170] sm:$0xff] %vm205_vm0, %v1141_v33  ;;  %v1142_v5 = vadd.f32 %v1028_v16, %v2329_v32  ;;  %v2342_v33 = vld [vmem:[#allocation30_spill] sm:$0xff] }
 0x274   :  { %1203 = vst.msk [vmem:[#allocation11 + $0x160] sm:$0xff] %vm205_vm0, %v1139_v13  ;;  %v1140_v41 = vadd.f32 %v1020_v62, %v2330_v46  ;;  %v1531_v13 = vld [vmem:[#allocation2 + $0x1e0] sm:$0xff] }
 0x275   :  { %1206 = vst.msk [vmem:[#allocation11 + $0x178] sm:$0xff] %vm205_vm0, %v1142_v5  ;;  %v1532_v5 = vld [vmem:[#allocation2 + $0x1f8] sm:$0xff] }
 0x276   :  { %1204 = vst.msk [vmem:[#allocation11 + $0x168] sm:$0xff] %vm205_vm0, %v1140_v41  ;;  %v1502_v21 = vpop.f32.mrb[48].mxu1  ;;  %v1533_v41 = vld [vmem:[#allocation2 + $0x1e8] sm:$0xff] }
 0x277   :  { %v1041_v58 = vadd.f32 %v1502_v21, %v2087_v40  ;;  %v1032_v18 = vpop.f32.mrb[49].mxu1 }
 0x278   :  { %v1033_v37 = vadd.f32 %v2087_v40, %v1032_v18  ;;  %v1503_v2 = vpop.f32.mrb[50].mxu1 }
 0x279   :  { %v1145_v15 = vadd.f32 %v1041_v58, %v2331_v14  ;;  %v1044_v42 = vadd.f32 %v1503_v2, %v2087_v40  ;;  %v1035_v10 = vpop.f32.mrb[51].mxu1 }
 0x27a   :  { %v1143_v23 = vadd.f32 %v1033_v37, %v2332_v38  ;;  %v1036_v51 = vadd.f32 %v2087_v40, %v1035_v10 }
 0x27b   :  { %1209 = vst.msk [vmem:[#allocation11 + $0x190] sm:$0xff] %vm205_vm0, %v1145_v15  ;;  %v1146_v6 = vadd.f32 %v1044_v42, %v2333_v47 }
 0x27c   :  { %1207 = vst.msk [vmem:[#allocation11 + $0x180] sm:$0xff] %vm205_vm0, %v1143_v23  ;;  %v1144_v43 = vadd.f32 %v1036_v51, %v2334_v19 }
 0x27d   :  { %1210 = vst.msk [vmem:[#allocation11 + $0x198] sm:$0xff] %vm205_vm0, %v1146_v6 }
 0x27e   :  { %1208 = vst.msk [vmem:[#allocation11 + $0x188] sm:$0xff] %vm205_vm0, %v1144_v43  ;;  %v1506_v45 = vpop.f32.mrb[52].mxu1 }
 0x27f   :  { %v1057_v3 = vadd.f32 %v1506_v45, %v2087_v40  ;;  %v1048_v63 = vpop.f32.mrb[53].mxu1 }
 0x280   :  { %v1049_v48 = vadd.f32 %v2087_v40, %v1048_v63  ;;  %v1507_v24 = vpop.f32.mrb[54].mxu1 }
 0x281   :  { %v1149_v9 = vadd.f32 %v1057_v3, %v2335_v44  ;;  %v1060_v20 = vadd.f32 %v1507_v24, %v2087_v40  ;;  %v1051_v53 = vpop.f32.mrb[55].mxu1 }
 0x282   :  { %v1147_v27 = vadd.f32 %v1049_v48, %v2336_v11  ;;  %v1052_v49 = vadd.f32 %v2087_v40, %v1051_v53 }
 0x283   :  { %1213 = vst.msk [vmem:[#allocation11 + $0x1b0] sm:$0xff] %vm205_vm0, %v1149_v9  ;;  %v1150_v22 = vadd.f32 %v1060_v20, %v2337_v29 }
 0x284   :  { %1211 = vst.msk [vmem:[#allocation11 + $0x1a0] sm:$0xff] %vm205_vm0, %v1147_v27  ;;  %v1148_v54 = vadd.f32 %v1052_v49, %v2338_v7 }
 0x285   :  { %1214 = vst.msk [vmem:[#allocation11 + $0x1b8] sm:$0xff] %vm205_vm0, %v1150_v22 }
 0x286   :  { %1212 = vst.msk [vmem:[#allocation11 + $0x1a8] sm:$0xff] %vm205_vm0, %v1148_v54  ;;  %v1510_v25 = vpop.f32.mrb[56].mxu1 }
 0x287   :  { %v1073_v50 = vadd.f32 %v1510_v25, %v2087_v40  ;;  %v1064_v0 = vpop.f32.mrb[57].mxu1 }
 0x288   :  { %v1065_v34 = vadd.f32 %v2087_v40, %v1064_v0  ;;  %v1511_v59 = vpop.f32.mrb[58].mxu1 }
 0x289   :  { %v1153_v30 = vadd.f32 %v1073_v50, %v2339_v39  ;;  %v1076_v55 = vadd.f32 %v1511_v59, %v2087_v40  ;;  %v1067_v12 = vpop.f32.mrb[59].mxu1 }
 0x28a   :  { %v1151_v57 = vadd.f32 %v1065_v34, %v2340_v26  ;;  %v1068_v60 = vadd.f32 %v2087_v40, %v1067_v12 }
 0x28b   :  { %1217 = vst.msk [vmem:[#allocation11 + $0x1d0] sm:$0xff] %vm205_vm0, %v1153_v30  ;;  %v1154_v56 = vadd.f32 %v1076_v55, %v2341_v8 }
 0x28c   :  { %1215 = vst.msk [vmem:[#allocation11 + $0x1c0] sm:$0xff] %vm205_vm0, %v1151_v57  ;;  %v1152_v28 = vadd.f32 %v1530_v35, %v1068_v60 }
 0x28d   :  { %1218 = vst.msk [vmem:[#allocation11 + $0x1d8] sm:$0xff] %vm205_vm0, %v1154_v56 }
 0x28e   :  { %1216 = vst.msk [vmem:[#allocation11 + $0x1c8] sm:$0xff] %vm205_vm0, %v1152_v28  ;;  %v1514_v1 = vpop.f32.mrb[60].mxu1 }
 0x28f   :  { %v1089_v52 = vadd.f32 %v1514_v1, %v2087_v40  ;;  %v1080_v31 = vpop.f32.mrb[61].mxu1 }
 0x290   :  { %v1081_v61 = vadd.f32 %v2087_v40, %v1080_v31  ;;  %v1515_v17 = vpop.f32.mrb[62].mxu1 }
 0x291   :  { %v1157_v16 = vadd.f32 %v1089_v52, %v2342_v33  ;;  %v1092_v4 = vadd.f32 %v1515_v17, %v2087_v40  ;;  %v1083_v36 = vpop.f32.mrb[63].mxu1 }
 0x292   :  { %v1155_v62 = vadd.f32 %v1531_v13, %v1081_v61  ;;  %v1084_v32 = vadd.f32 %v2087_v40, %v1083_v36 }
 0x293   :  { %1221 = vst.msk [vmem:[#allocation11 + $0x1f0] sm:$0xff] %vm205_vm0, %v1157_v16  ;;  %v1158_v46 = vadd.f32 %v1532_v5, %v1092_v4 }
 0x294   :  { %1219 = vst.msk [vmem:[#allocation11 + $0x1e0] sm:$0xff] %vm205_vm0, %v1155_v62  ;;  %v1156_v21 = vadd.f32 %v1533_v41, %v1084_v32 }
 0x295   :  { %1222 = vst.msk [vmem:[#allocation11 + $0x1f8] sm:$0xff] %vm205_vm0, %v1158_v46 }
 0x296   :  { %1220 = vst.msk [vmem:[#allocation11 + $0x1e8] sm:$0xff] %vm205_vm0, %v1156_v21 }
 0x297   :  { %1655 = shalt.err (!%p1652_p2)
}
 0x298   :  { %s1656_s9 = scalar_lea.hbm %s2297_s5, 8192 }
 0x299   :  { %p1657_p3 = scmp.ne.s32.totalorder %s2297_s5, %s1656_s9  ;;  %p1660_p4 = scmp.lt.u32.totalorder %s1656_s9, %s2297_s5 }
 0x29b   :  { %p1662_p5 = pnand %p1660_p4, %p1657_p3 }
 0x29d   :  { %1665 = shalt.err (!%p1662_p5)
}
 0x29e   :  { %1234 = dma.vmem_to_hbm [thread:$0]  %s1229_s30, 8192, %s2297_s5, [#allocation4], %s1679_s3, %s1679_s3, %s1680_s28  }
 0x29f   :  { %1672 = dma.done.wait [#allocation4], 8192  }
 0x2a0   :  { %1673 = vsyncadd [#allocation4], 4294959104 }
 0x2a1   :  { %1238 = vsyncpa [#allocation3], 1 }
 0x2a2   :  { %1239 = vsyncpa [#allocation6], 1 }
 0x2a3   :  { %1240 = vsyncpa [#allocation9], 1 }
 0x2a4   :  { %1241 = vsyncpa [#allocation4], 1 }

// kernel: _skip_connection.1
= control target key start
LH: loop header
LB: loop body
LE: loop exit
PB: predicated region body
PF: predicated region fallthrough
CT: control target
= control target key end

     0   :  { %10 = vsyncpa [#allocation3], 0  ;;  %s2292_s0 = inlined_call_operand.hbm [shape: f32[512,32], index: 0, kind: input, shape index: {}]   ;;  %s2293_s1 = inlined_call_operand.hbm [shape: bf16[32,32], index: 1, kind: input, shape index: {}]   ;;  %s2294_s2 = inlined_call_operand.hbm [shape: f32[1,32], index: 2, kind: input, shape index: {}]   ;;  %s2295_s3 = inlined_call_operand.hbm [shape: bf16[32,32], index: 3, kind: input, shape index: {}]   ;;  %s2296_s4 = inlined_call_operand.hbm [shape: f32[1,32], index: 4, kind: input, shape index: {}]   ;;  %s2297_s5 = inlined_call_operand.hbm [shape: f32[512,32], index: 5, kind: output, shape index: {}]  }
   0x1   :  { %11 = vsyncpa [#allocation6], 0 }
   0x2   :  { %12 = vsyncpa [#allocation9], 0 }
   0x3   :  { %13 = vsyncpa [#allocation4], 0  ;;  %s1674_s18 = smov [#allocation5]   ;;  %s1534_s22 = scalar_lea.hbm %s2293_s1, 256 }
   0x4   :  { %s31_s19 = sshll.u32 %s1674_s18, 4  ;;  %p1535_p0 = scmp.ne.s32.totalorder %s2293_s1, %s1534_s22  ;;  %s32_s19 = int_to_ptr.vmem [resolvable:$true] %s31_s19 }
   0x5   :  { %p1538_p1 = scmp.lt.u32.totalorder %s1534_s22, %s2293_s1 }
   0x7   :  { %p1540_p2 = pnand %p1538_p1, %p1535_p0 }
   0x9   :  { %1543 = shalt.err (!%p1540_p2)
}
   0xa   :  { %s1544_s27 = scalar_lea.vmem %s32_s19, 256  ;;  %p1549_p4 = scmp.lt.s32.totalorder %s32_s19, %s32_s19 }
   0xb   :  { %p1545_p3 = scmp.ne.s32.totalorder %s32_s19, %s1544_s27  ;;  %p1550_p5 = scmp.lt.s32.totalorder %s1544_s27, %s1544_s27 }
   0xd   :  { %p1551_p6 = por %p1550_p5, %p1549_p4 }
   0xf   :  { %p1552_p7 = pnand %p1551_p6, %p1545_p3 }
  0x11   :  { %1555 = shalt.err (!%p1552_p7)
}
  0x12   :  { %s1675_s28 = smov 64   ;;  %s1676_s29 = smov 4  }
  0x13   :  { %37 = dma.hbm_to_vmem [thread:$0]  %s2293_s1, 256, %s32_s19, [#allocation6], %s1675_s28, %s1675_s28, %s1676_s29  }
  0x14   :  { %s1677_s7 = smov [#allocation8]   ;;  %s1678_s9 = smov [#allocation2]  }
  0x15   :  { %s53_s8 = sshll.u32 %s1677_s7, 4  ;;  %s19_s10 = sshll.u32 %s1678_s9, 4  ;;  %s54_s8 = int_to_ptr.vmem [resolvable:$true] %s53_s8  ;;  %s20_s10 = int_to_ptr.vmem [resolvable:$true] %s19_s10 }
  0x16   :  { %s1556_s13 = scalar_lea.hbm %s2295_s3, 256 }
  0x17   :  { %p1557_p8 = scmp.ne.s32.totalorder %s2295_s3, %s1556_s13  ;;  %p1560_p9 = scmp.lt.u32.totalorder %s1556_s13, %s2295_s3 }
  0x19   :  { %p1562_p10 = pnand %p1560_p9, %p1557_p8 }
  0x1b   :  { %1565 = shalt.err (!%p1562_p10)
}
  0x1c   :  { %s1566_s1 = scalar_lea.vmem %s54_s8, 256  ;;  %p1571_p12 = scmp.lt.s32.totalorder %s54_s8, %s54_s8 }
  0x1d   :  { %p1567_p11 = scmp.ne.s32.totalorder %s54_s8, %s1566_s1  ;;  %p1572_p13 = scmp.lt.s32.totalorder %s1566_s1, %s1566_s1 }
  0x1f   :  { %p1573_p0 = por %p1572_p13, %p1571_p12 }
  0x21   :  { %p1574_p1 = pnand %p1573_p0, %p1567_p11 }
  0x23   :  { %1577 = shalt.err (!%p1574_p1)
}
  0x24   :  { %59 = dma.hbm_to_vmem [thread:$0]  %s2295_s3, 256, %s54_s8, [#allocation9], %s1675_s28, %s1675_s28, %s1676_s29  }
  0x25   :  { %s1578_s22 = scalar_lea.hbm %s2292_s0, 8192 }
  0x26   :  { %p1579_p2 = scmp.ne.s32.totalorder %s2292_s0, %s1578_s22  ;;  %p1582_p3 = scmp.lt.u32.totalorder %s1578_s22, %s2292_s0 }
  0x28   :  { %p1584_p4 = pnand %p1582_p3, %p1579_p2 }
  0x2a   :  { %1587 = shalt.err (!%p1584_p4)
}
  0x2b   :  { %s1588_s27 = scalar_lea.vmem %s20_s10, 8192  ;;  %p1593_p6 = scmp.lt.s32.totalorder %s20_s10, %s20_s10 }
  0x2c   :  { %p1589_p5 = scmp.ne.s32.totalorder %s20_s10, %s1588_s27  ;;  %p1594_p7 = scmp.lt.s32.totalorder %s1588_s27, %s1588_s27 }
  0x2e   :  { %p1595_p8 = por %p1594_p7, %p1593_p6 }
  0x30   :  { %p1596_p9 = pnand %p1595_p8, %p1589_p5 }
  0x32   :  { %1599 = shalt.err (!%p1596_p9)
}
  0x33   :  { %s1679_s3 = smov 128   ;;  %s1680_s28 = smov 8  }
  0x34   :  { %25 = dma.hbm_to_vmem [thread:$0]  %s2292_s0, 8192, %s20_s10, [#allocation3], %s1679_s3, %s1679_s3, %s1680_s28  }
  0x35   :  { %s1681_s6 = smov [#allocation7]   ;;  %s1682_s8 = smov [#allocation10]  }
  0x36   :  { %s44_s7 = sshll.u32 %s1681_s6, 4  ;;  %s66_s9 = sshll.u32 %s1682_s8, 4  ;;  %s45_s7 = int_to_ptr.vmem [resolvable:$true] %s44_s7  ;;  %s67_s9 = int_to_ptr.vmem [resolvable:$true] %s66_s9 }
  0x37   :  { %s1600_s13 = scalar_lea.hbm %s2294_s2, 16 }
  0x38   :  { %p1601_p10 = scmp.ne.s32.totalorder %s2294_s2, %s1600_s13  ;;  %p1604_p11 = scmp.lt.u32.totalorder %s1600_s13, %s2294_s2 }
  0x3a   :  { %p1606_p12 = pnand %p1604_p11, %p1601_p10 }
  0x3c   :  { %1609 = shalt.err (!%p1606_p12)
}
  0x3d   :  { %s1610_s0 = scalar_lea.vmem %s45_s7, 16  ;;  %s1614_s10 = scalar_lea.vmem %s45_s7, 32 }
  0x3e   :  { %p1611_p13 = scmp.ne.s32.totalorder %s45_s7, %s1610_s0  ;;  %p1615_p0 = scmp.lt.s32.totalorder %s45_s7, %s45_s7 }
  0x3f   :  { %p1616_p1 = scmp.lt.s32.totalorder %s1614_s10, %s1610_s0 }
  0x41   :  { %p1617_p2 = por %p1616_p1, %p1615_p0 }
  0x43   :  { %p1618_p3 = pnand %p1617_p2, %p1611_p13 }
  0x45   :  { %1621 = shalt.err (!%p1618_p3)
}
  0x46   :  { %47 = dma.hbm_to_vmem [thread:$0]  %s2294_s2, 16, %s45_s7, [#allocation6]  }
  0x47   :  { %s1622_s21 = scalar_lea.hbm %s2296_s4, 16 }
  0x48   :  { %p1623_p4 = scmp.ne.s32.totalorder %s2296_s4, %s1622_s21  ;;  %p1626_p5 = scmp.lt.u32.totalorder %s1622_s21, %s2296_s4 }
  0x4a   :  { %p1628_p6 = pnand %p1626_p5, %p1623_p4 }
  0x4c   :  { %1631 = shalt.err (!%p1628_p6)
}
  0x4d   :  { %s1632_s26 = scalar_lea.vmem %s67_s9, 16  ;;  %s1636_s27 = scalar_lea.vmem %s67_s9, 32 }
  0x4e   :  { %p1633_p7 = scmp.ne.s32.totalorder %s67_s9, %s1632_s26  ;;  %p1637_p8 = scmp.lt.s32.totalorder %s67_s9, %s67_s9 }
  0x4f   :  { %p1638_p9 = scmp.lt.s32.totalorder %s1636_s27, %s1632_s26 }
  0x51   :  { %p1639_p10 = por %p1638_p9, %p1637_p8 }
  0x53   :  { %p1640_p11 = pnand %p1639_p10, %p1633_p7 }
  0x55   :  { %1643 = shalt.err (!%p1640_p11)
}
  0x56   :  { %69 = dma.hbm_to_vmem [thread:$0]  %s2296_s4, 16, %s67_s9, [#allocation9]  }
  0x57   :  { %1666 = dma.done.wait [#allocation3], 8192  }
  0x58   :  { %1667 = vsyncadd [#allocation3], 4294959104 }
  0x59   :  { %1668 = dma.done.wait [#allocation6], 272  }
  0x5a   :  { %1669 = vsyncadd [#allocation6], 4294967024 }
  0x5b   :  { %1670 = dma.done.wait [#allocation9], 272  }
  0x5c   :  { %1671 = vsyncadd [#allocation9], 4294967024  ;;  %v1526_v0 = vld [vmem:[#allocation5] sm:$0xff]   ;;  %v1527_v1 = vld [vmem:[#allocation5 + $0x8] sm:$0xff]   ;;  %vm205_vm0 = vcmask 261120   ;;  %s1683_s4 = smov [#allocation11]  }
  0x5d   :  { %1380 = vmatprep.subr.bf16.mxu0 %v1526_v0  ;;  %v1777_v2 = vld [vmem:[#allocation2] sm:$0xff]  ;;  %v1779_v3 = vld [vmem:[#allocation2 + $0x8] sm:$0xff]  ;;  %v1783_v5 = vld [vmem:[#allocation2 + $0x10] sm:$0xff]  ;;  %s1228_s30 = sshll.u32 %s1683_s4, 4  ;;  %s1229_s30 = int_to_ptr.vmem [resolvable:$true] %s1228_s30 }
  0x5e   :  { %1381 = vmatpush3.bf16.msra.mxu0 %v1526_v0  ;;  %v150_v4 = vpack.c.bf16 %v1779_v3, %v1777_v2  ;;  %v1785_v6 = vld [vmem:[#allocation2 + $0x18] sm:$0xff]  ;;  %v1787_v7 = vld [vmem:[#allocation2 + $0x20] sm:$0xff]  ;;  %v1789_v8 = vld [vmem:[#allocation2 + $0x28] sm:$0xff]  ;;  %s1644_s6 = scalar_lea.vmem %s1229_s30, 8192  ;;  %p1649_p13 = scmp.lt.s32.totalorder %s1229_s30, %s1229_s30 }
  0x5f   :  { %1382 = vmatprep.subr.bf16.mxu0 %v1527_v1  ;;  %v151_v9 = vpack.c.bf16 %v1785_v6, %v1783_v5  ;;  %v152_v10 = vpack.c.bf16 %v1789_v8, %v1787_v7  ;;  %v1798_v11 = vld [vmem:[#allocation2 + $0x30] sm:$0xff]  ;;  %v1800_v12 = vld [vmem:[#allocation2 + $0x38] sm:$0xff]  ;;  %v1802_v13 = vld [vmem:[#allocation2 + $0x40] sm:$0xff]  ;;  %p1645_p12 = scmp.ne.s32.totalorder %s1229_s30, %s1644_s6  ;;  %p1650_p0 = scmp.lt.s32.totalorder %s1644_s6, %s1644_s6 }
  0x60   :  { %1384 = vmatprep.mubr.msk.bf16.mxu0 %vm205_vm0, %v150_v4  ;;  %v1804_v14 = vld [vmem:[#allocation2 + $0x48] sm:$0xff]  ;;  %v153_v15 = vpack.c.bf16 %v1800_v12, %v1798_v11  ;;  %v1812_v17 = vld [vmem:[#allocation2 + $0x50] sm:$0xff]  ;;  %v1814_v18 = vld [vmem:[#allocation2 + $0x58] sm:$0xff] }
  0x61   :  { %v154_v16 = vpack.c.bf16 %v1804_v14, %v1802_v13  ;;  %v1816_v19 = vld [vmem:[#allocation2 + $0x60] sm:$0xff]  ;;  %v1818_v20 = vld [vmem:[#allocation2 + $0x68] sm:$0xff]  ;;  %v155_v21 = vpack.c.bf16 %v1814_v18, %v1812_v17  ;;  %v1826_v23 = vld [vmem:[#allocation2 + $0x70] sm:$0xff]  ;;  %p1651_p1 = por %p1650_p0, %p1649_p13 }
  0x62   :  { %1383 = vmatpush3.bf16.msra.mxu0 %v1527_v1  ;;  %v156_v22 = vpack.c.bf16 %v1818_v20, %v1816_v19  ;;  %v1828_v24 = vld [vmem:[#allocation2 + $0x78] sm:$0xff]  ;;  %v1830_v25 = vld [vmem:[#allocation2 + $0x80] sm:$0xff]  ;;  %v1832_v26 = vld [vmem:[#allocation2 + $0x88] sm:$0xff] }
  0x63   :  { %v157_v27 = vpack.c.bf16 %v1828_v24, %v1826_v23  ;;  %v158_v28 = vpack.c.bf16 %v1832_v26, %v1830_v25  ;;  %v1840_v29 = vld [vmem:[#allocation2 + $0x90] sm:$0xff]  ;;  %v1842_v30 = vld [vmem:[#allocation2 + $0x98] sm:$0xff]  ;;  %v1844_v31 = vld [vmem:[#allocation2 + $0xa0] sm:$0xff]  ;;  %p1652_p2 = pnand %p1651_p1, %p1645_p12 }
  0x64   :  { %v1846_v32 = vld [vmem:[#allocation2 + $0xa8] sm:$0xff]  ;;  %v159_v33 = vpack.c.bf16 %v1842_v30, %v1840_v29  ;;  %v1854_v35 = vld [vmem:[#allocation2 + $0xb0] sm:$0xff]  ;;  %v1856_v36 = vld [vmem:[#allocation2 + $0xb8] sm:$0xff] }
  0x65   :  { %1385 = vmatmul.mubr.msk.bf16.vlgmr.msra.gmra.mrb[0].mxu0 %vm205_vm0, %v151_v9  ;;  %v160_v34 = vpack.c.bf16 %v1846_v32, %v1844_v31  ;;  %v1858_v37 = vld [vmem:[#allocation2 + $0xc0] sm:$0xff]  ;;  %v1860_v38 = vld [vmem:[#allocation2 + $0xc8] sm:$0xff]  ;;  %v161_v39 = vpack.c.bf16 %v1856_v36, %v1854_v35  ;;  %v1868_v41 = vld [vmem:[#allocation2 + $0xd0] sm:$0xff] }
  0x66   :  { %1388 = vmatprep.mubr.msk.bf16.mxu0 %vm205_vm0, %v152_v10  ;;  %v162_v40 = vpack.c.bf16 %v1860_v38, %v1858_v37  ;;  %v1870_v42 = vld [vmem:[#allocation2 + $0xd8] sm:$0xff]  ;;  %v1872_v43 = vld [vmem:[#allocation2 + $0xe0] sm:$0xff]  ;;  %v1874_v44 = vld [vmem:[#allocation2 + $0xe8] sm:$0xff] }
  0x67   :  { %v163_v45 = vpack.c.bf16 %v1870_v42, %v1868_v41  ;;  %v164_v46 = vpack.c.bf16 %v1874_v44, %v1872_v43  ;;  %v1882_v47 = vld [vmem:[#allocation2 + $0xf0] sm:$0xff]  ;;  %v1884_v48 = vld [vmem:[#allocation2 + $0xf8] sm:$0xff]  ;;  %v1886_v49 = vld [vmem:[#allocation2 + $0x100] sm:$0xff] }
  0x68   :  { %v1888_v50 = vld [vmem:[#allocation2 + $0x108] sm:$0xff]  ;;  %v165_v51 = vpack.c.bf16 %v1884_v48, %v1882_v47  ;;  %v1896_v53 = vld [vmem:[#allocation2 + $0x110] sm:$0xff]  ;;  %v1898_v54 = vld [vmem:[#allocation2 + $0x118] sm:$0xff] }
  0x69   :  { %v166_v52 = vpack.c.bf16 %v1888_v50, %v1886_v49  ;;  %v1900_v55 = vld [vmem:[#allocation2 + $0x120] sm:$0xff]  ;;  %v1902_v56 = vld [vmem:[#allocation2 + $0x128] sm:$0xff]  ;;  %v167_v57 = vpack.c.bf16 %v1898_v54, %v1896_v53  ;;  %v1910_v59 = vld [vmem:[#allocation2 + $0x130] sm:$0xff] }
  0x6a   :  { %v168_v58 = vpack.c.bf16 %v1902_v56, %v1900_v55  ;;  %v1912_v60 = vld [vmem:[#allocation2 + $0x138] sm:$0xff]  ;;  %v1914_v61 = vld [vmem:[#allocation2 + $0x140] sm:$0xff]  ;;  %v1916_v62 = vld [vmem:[#allocation2 + $0x148] sm:$0xff] }
  0x6b   :  { %v169_v63 = vpack.c.bf16 %v1912_v60, %v1910_v59  ;;  %v170_v0 = vpack.c.bf16 %v1916_v62, %v1914_v61  ;;  %v1924_v1 = vld [vmem:[#allocation2 + $0x150] sm:$0xff]  ;;  %v1926_v4 = vld [vmem:[#allocation2 + $0x158] sm:$0xff]  ;;  %v1928_v9 = vld [vmem:[#allocation2 + $0x160] sm:$0xff] }
  0x6c   :  { %2313 = vst [vmem:[#allocation16_spill] sm:$0xff] %v1928_v9  ;;  %v1930_v10 = vld [vmem:[#allocation2 + $0x168] sm:$0xff] }
  0x6d   :  { %1389 = vmatmul.mubr.msk.bf16.gmra.mrb[4].mxu0 %vm205_vm0, %v153_v15  ;;  %2314 = vst [vmem:[#allocation17_spill] sm:$0xff] %v1930_v10  ;;  %v171_v15 = vpack.c.bf16 %v1926_v4, %v1924_v1 }
  0x6e   :  { %1392 = vmatprep.mubr.msk.bf16.mxu0 %vm205_vm0, %v154_v16  ;;  %v172_v16 = vpack.c.bf16 %v1930_v10, %v1928_v9 }
  0x75   :  { %1393 = vmatmul.mubr.msk.bf16.gmra.mrb[8].mxu0 %vm205_vm0, %v155_v21  ;;  %v1938_v21 = vld [vmem:[#allocation2 + $0x170] sm:$0xff] }
  0x76   :  { %1396 = vmatprep.mubr.msk.bf16.mxu0 %vm205_vm0, %v156_v22  ;;  %v1940_v22 = vld [vmem:[#allocation2 + $0x178] sm:$0xff] }
  0x77   :  { %2315 = vst [vmem:[#allocation18_spill] sm:$0xff] %v1940_v22 }
  0x7d   :  { %1397 = vmatmul.mubr.msk.bf16.gmra.mrb[12].mxu0 %vm205_vm0, %v157_v27  ;;  %v1942_v27 = vld [vmem:[#allocation2 + $0x180] sm:$0xff] }
  0x7e   :  { %1400 = vmatprep.mubr.msk.bf16.mxu0 %vm205_vm0, %v158_v28  ;;  %2316 = vst [vmem:[#allocation19_spill] sm:$0xff] %v1942_v27  ;;  %v1944_v28 = vld [vmem:[#allocation2 + $0x188] sm:$0xff] }
  0x7f   :  { %2317 = vst [vmem:[#allocation20_spill] sm:$0xff] %v1944_v28 }
  0x85   :  { %1401 = vmatmul.mubr.msk.bf16.gmra.mrb[16].mxu0 %vm205_vm0, %v159_v33  ;;  %v173_v33 = vpack.c.bf16 %v1940_v22, %v1938_v21 }
  0x86   :  { %1404 = vmatprep.mubr.msk.bf16.mxu0 %vm205_vm0, %v160_v34  ;;  %v1528_v34 = vld [vmem:[#allocation8] sm:$0xff]  }
  0x87   :  { %1448 = vmatprep.subr.bf16.mxu1 %v1528_v34 }
  0x88   :  { %1449 = vmatpush3.bf16.msra.mxu1 %v1528_v34 }
  0x8d   :  { %1405 = vmatmul.mubr.msk.bf16.gmra.mrb[20].mxu0 %vm205_vm0, %v161_v39  ;;  %v174_v39 = vpack.c.bf16 %v1944_v28, %v1942_v27 }
  0x8e   :  { %1408 = vmatprep.mubr.msk.bf16.mxu0 %vm205_vm0, %v162_v40  ;;  %v1529_v40 = vld [vmem:[#allocation8 + $0x8] sm:$0xff]  }
  0x8f   :  { %1450 = vmatprep.subr.bf16.mxu1 %v1529_v40 }
  0x90   :  { %1451 = vmatpush3.bf16.msra.mxu1 %v1529_v40  ;;  %v1979_v40 = vld [vmem:[#allocation2 + $0x1d8] sm:$0xff] }
  0x91   :  { %2326 = vst [vmem:[#allocation29_spill] sm:$0xff] %v1979_v40 }
  0x95   :  { %1409 = vmatmul.mubr.msk.bf16.gmra.mrb[24].mxu0 %vm205_vm0, %v163_v45  ;;  %v1952_v45 = vld [vmem:[#allocation2 + $0x190] sm:$0xff] }
  0x96   :  { %1412 = vmatprep.mubr.msk.bf16.mxu0 %vm205_vm0, %v164_v46  ;;  %2318 = vst [vmem:[#allocation21_spill] sm:$0xff] %v1952_v45  ;;  %v1954_v46 = vld [vmem:[#allocation2 + $0x198] sm:$0xff] }
  0x97   :  { %2319 = vst [vmem:[#allocation22_spill] sm:$0xff] %v1954_v46 }
  0x9d   :  { %1413 = vmatmul.mubr.msk.bf16.gmra.mrb[28].mxu0 %vm205_vm0, %v165_v51  ;;  %v1956_v51 = vld [vmem:[#allocation2 + $0x1a0] sm:$0xff] }
  0x9e   :  { %1416 = vmatprep.mubr.msk.bf16.mxu0 %vm205_vm0, %v166_v52  ;;  %2320 = vst [vmem:[#allocation23_spill] sm:$0xff] %v1956_v51  ;;  %v1958_v52 = vld [vmem:[#allocation2 + $0x1a8] sm:$0xff] }
  0x9f   :  { %2321 = vst [vmem:[#allocation24_spill] sm:$0xff] %v1958_v52 }
  0xa5   :  { %1417 = vmatmul.mubr.msk.bf16.gmra.mrb[32].mxu0 %vm205_vm0, %v167_v57  ;;  %v175_v57 = vpack.c.bf16 %v1954_v46, %v1952_v45 }
  0xa6   :  { %1420 = vmatprep.mubr.msk.bf16.mxu0 %vm205_vm0, %v168_v58  ;;  %v176_v58 = vpack.c.bf16 %v1958_v52, %v1956_v51 }
  0xad   :  { %1421 = vmatmul.mubr.msk.bf16.gmra.mrb[36].mxu0 %vm205_vm0, %v169_v63  ;;  %v1966_v63 = vld [vmem:[#allocation2 + $0x1b0] sm:$0xff] }
  0xae   :  { %1424 = vmatprep.mubr.msk.bf16.mxu0 %vm205_vm0, %v170_v0  ;;  %2322 = vst [vmem:[#allocation25_spill] sm:$0xff] %v1966_v63  ;;  %v1968_v0 = vld [vmem:[#allocation2 + $0x1b8] sm:$0xff] }
  0xaf   :  { %2323 = vst [vmem:[#allocation26_spill] sm:$0xff] %v1968_v0 }
  0xb5   :  { %1425 = vmatmul.mubr.msk.bf16.gmra.mrb[40].mxu0 %vm205_vm0, %v171_v15  ;;  %v1970_v15 = vld [vmem:[#allocation2 + $0x1c0] sm:$0xff] }
  0xb6   :  { %1428 = vmatprep.mubr.msk.bf16.mxu0 %vm205_vm0, %v172_v16  ;;  %2324 = vst [vmem:[#allocation27_spill] sm:$0xff] %v1970_v15  ;;  %v143_v16 = vld [vmem:[#allocation2 + $0x1c8] sm:$0xff] }
  0xb7   :  { %v178_v34 = vpack.c.bf16 %v143_v16, %v1970_v15  ;;  %v149_v16 = vld [vmem:[#allocation2 + $0x1f8] sm:$0xff] }
  0xbd   :  { %1429 = vmatmul.mubr.msk.bf16.gmra.mrb[44].mxu0 %vm205_vm0, %v173_v33  ;;  %v177_v33 = vpack.c.bf16 %v1968_v0, %v1966_v63  ;;  %v1985_v0 = vld [vmem:[#allocation2 + $0x1f0] sm:$0xff] }
  0xbe   :  { %1432 = vmatprep.mubr.msk.bf16.mxu0 %vm205_vm0, %v174_v39  ;;  %v1977_v39 = vld [vmem:[#allocation2 + $0x1d0] sm:$0xff]  ;;  %2327 = vst [vmem:[#allocation30_spill] sm:$0xff] %v1985_v0 }
  0xbf   :  { %2325 = vst [vmem:[#allocation28_spill] sm:$0xff] %v1977_v39  ;;  %v179_v52 = vpack.c.bf16 %v1979_v40, %v1977_v39 }
  0xc5   :  { %1433 = vmatmul.mubr.msk.bf16.gmra.mrb[48].mxu0 %vm205_vm0, %v175_v57  ;;  %v146_v57 = vld [vmem:[#allocation2 + $0x1e0] sm:$0xff] }
  0xc6   :  { %1436 = vmatprep.mubr.msk.bf16.mxu0 %vm205_vm0, %v176_v58  ;;  %v147_v58 = vld [vmem:[#allocation2 + $0x1e8] sm:$0xff] }
  0xc7   :  { %v180_v51 = vpack.c.bf16 %v147_v58, %v146_v57 }
  0xcd   :  { %1437 = vmatmul.mubr.msk.bf16.gmra.mrb[52].mxu0 %vm205_vm0, %v177_v33  ;;  %v181_v33 = vpack.c.bf16 %v149_v16, %v1985_v0 }
  0xce   :  { %1440 = vmatprep.mubr.msk.bf16.mxu0 %vm205_vm0, %v178_v34  ;;  %v1989_v34 = vld [vmem:[#allocation7] ss:$0 sm:$0xff] }
  0xd5   :  { %1441 = vmatmul.mubr.msk.bf16.gmra.mrb[56].mxu0 %vm205_vm0, %v179_v52 }
  0xd6   :  { %1444 = vmatprep.mubr.msk.bf16.mxu0 %vm205_vm0, %v180_v51 }
  0xdd   :  { %1445 = vmatmul.mubr.msk.bf16.gmra.mrb[60].mxu0 %vm205_vm0, %v181_v33 }
 0x138   :  { %v1386_v15 = vpop.f32.mrb[0].mxu0 }
 0x139   :  { %v345_v63 = vadd.f32 %v1386_v15, %v1989_v34  ;;  %v336_v28 = vpop.f32.mrb[1].mxu0 }
 0x13a   :  { %v337_v40 = vadd.f32 %v1989_v34, %v336_v28  ;;  %v1387_v57 = vpop.f32.mrb[2].mxu0 }
 0x13b   :  { %v348_v52 = vadd.f32 %v1387_v57, %v1989_v34  ;;  %v339_v58 = vpop.f32.mrb[3].mxu0  ;;  %v593_v39 = vmax.f32 %v345_v63, 0.0 }
 0x13c   :  { %v340_v51 = vadd.f32 %v1989_v34, %v339_v58  ;;  %v591_v27 = vmax.f32 %v337_v40, 0.0 }
 0x13d   :  { %v594_v46 = vmax.f32 %v348_v52, 0.0 }
 0x13e   :  { %v592_v16 = vmax.f32 %v340_v51, 0.0 }
 0x13f   :  { %v656_v0 = vpack.c.bf16 %v594_v46, %v593_v39 }
 0x140   :  { %v1390_v33 = vpop.f32.mrb[4].mxu0  ;;  %v655_v45 = vpack.c.bf16 %v592_v16, %v591_v27 }
 0x141   :  { %v361_v10 = vadd.f32 %v1390_v33, %v1989_v34  ;;  %v352_v22 = vpop.f32.mrb[5].mxu0 }
 0x142   :  { %v353_v15 = vadd.f32 %v1989_v34, %v352_v22  ;;  %v1391_v9 = vpop.f32.mrb[6].mxu0  ;;  %1452 = vmatprep.mubr.msk.bf16.mxu1 %vm205_vm0, %v655_v45 }
 0x143   :  { %v364_v28 = vadd.f32 %v1391_v9, %v1989_v34  ;;  %v355_v57 = vpop.f32.mrb[7].mxu0  ;;  %1453 = vmatmul.mubr.msk.bf16.vlgmr.msra.gmra.mrb[0].mxu1 %vm205_vm0, %v656_v0  ;;  %v597_v40 = vmax.f32 %v361_v10, 0.0 }
 0x144   :  { %v356_v63 = vadd.f32 %v1989_v34, %v355_v57  ;;  %v595_v46 = vmax.f32 %v353_v15, 0.0 }
 0x145   :  { %v598_v52 = vmax.f32 %v364_v28, 0.0 }
 0x146   :  { %v596_v39 = vmax.f32 %v356_v63, 0.0 }
 0x147   :  { %v658_v27 = vpack.c.bf16 %v598_v52, %v597_v40 }
 0x148   :  { %v657_v58 = vpack.c.bf16 %v596_v39, %v595_v46  ;;  %v1394_v51 = vpop.f32.mrb[8].mxu0 }
 0x149   :  { %v377_v16 = vadd.f32 %v1394_v51, %v1989_v34  ;;  %v368_v22 = vpop.f32.mrb[9].mxu0 }
 0x14a   :  { %v369_v33 = vadd.f32 %v1989_v34, %v368_v22  ;;  %v1395_v45 = vpop.f32.mrb[10].mxu0  ;;  %1456 = vmatprep.mubr.msk.bf16.mxu1 %vm205_vm0, %v657_v58 }
 0x14b   :  { %v380_v9 = vadd.f32 %v1395_v45, %v1989_v34  ;;  %v371_v0 = vpop.f32.mrb[11].mxu0  ;;  %1457 = vmatmul.mubr.msk.bf16.gmra.mrb[4].mxu1 %vm205_vm0, %v658_v27  ;;  %v601_v15 = vmax.f32 %v377_v16, 0.0 }
 0x14c   :  { %v372_v10 = vadd.f32 %v1989_v34, %v371_v0  ;;  %v599_v57 = vmax.f32 %v369_v33, 0.0 }
 0x14d   :  { %v602_v28 = vmax.f32 %v380_v9, 0.0 }
 0x14e   :  { %v600_v63 = vmax.f32 %v372_v10, 0.0 }
 0x14f   :  { %v660_v40 = vpack.c.bf16 %v602_v28, %v601_v15 }
 0x150   :  { %v659_v52 = vpack.c.bf16 %v600_v63, %v599_v57  ;;  %v1398_v46 = vpop.f32.mrb[12].mxu0 }
 0x151   :  { %v393_v39 = vadd.f32 %v1398_v46, %v1989_v34  ;;  %v384_v51 = vpop.f32.mrb[13].mxu0 }
 0x152   :  { %v385_v22 = vadd.f32 %v1989_v34, %v384_v51  ;;  %v1399_v58 = vpop.f32.mrb[14].mxu0  ;;  %1460 = vmatprep.mubr.msk.bf16.mxu1 %vm205_vm0, %v659_v52 }
 0x153   :  { %v396_v45 = vadd.f32 %v1399_v58, %v1989_v34  ;;  %v387_v27 = vpop.f32.mrb[15].mxu0  ;;  %1461 = vmatmul.mubr.msk.bf16.gmra.mrb[8].mxu1 %vm205_vm0, %v660_v40  ;;  %v605_v33 = vmax.f32 %v393_v39, 0.0 }
 0x154   :  { %v388_v16 = vadd.f32 %v1989_v34, %v387_v27  ;;  %v603_v0 = vmax.f32 %v385_v22, 0.0 }
 0x155   :  { %v606_v9 = vmax.f32 %v396_v45, 0.0 }
 0x156   :  { %v604_v10 = vmax.f32 %v388_v16, 0.0 }
 0x157   :  { %v662_v15 = vpack.c.bf16 %v606_v9, %v605_v33 }
 0x158   :  { %v661_v28 = vpack.c.bf16 %v604_v10, %v603_v0  ;;  %v1402_v57 = vpop.f32.mrb[16].mxu0 }
 0x159   :  { %v409_v63 = vadd.f32 %v1402_v57, %v1989_v34  ;;  %v400_v46 = vpop.f32.mrb[17].mxu0 }
 0x15a   :  { %v401_v51 = vadd.f32 %v1989_v34, %v400_v46  ;;  %v1403_v52 = vpop.f32.mrb[18].mxu0  ;;  %1464 = vmatprep.mubr.msk.bf16.mxu1 %vm205_vm0, %v661_v28 }
 0x15b   :  { %v412_v58 = vadd.f32 %v1403_v52, %v1989_v34  ;;  %v403_v40 = vpop.f32.mrb[19].mxu0  ;;  %1465 = vmatmul.mubr.msk.bf16.gmra.mrb[12].mxu1 %vm205_vm0, %v662_v15  ;;  %v609_v22 = vmax.f32 %v409_v63, 0.0 }
 0x15c   :  { %v404_v39 = vadd.f32 %v1989_v34, %v403_v40  ;;  %v607_v27 = vmax.f32 %v401_v51, 0.0 }
 0x15d   :  { %v610_v45 = vmax.f32 %v412_v58, 0.0 }
 0x15e   :  { %v608_v16 = vmax.f32 %v404_v39, 0.0 }
 0x15f   :  { %v664_v33 = vpack.c.bf16 %v610_v45, %v609_v22 }
 0x160   :  { %v663_v9 = vpack.c.bf16 %v608_v16, %v607_v27  ;;  %v1406_v0 = vpop.f32.mrb[20].mxu0 }
 0x161   :  { %v425_v10 = vadd.f32 %v1406_v0, %v1989_v34  ;;  %v416_v57 = vpop.f32.mrb[21].mxu0 }
 0x162   :  { %v417_v46 = vadd.f32 %v1989_v34, %v416_v57  ;;  %v1407_v28 = vpop.f32.mrb[22].mxu0  ;;  %1468 = vmatprep.mubr.msk.bf16.mxu1 %vm205_vm0, %v663_v9 }
 0x163   :  { %v428_v52 = vadd.f32 %v1407_v28, %v1989_v34  ;;  %v419_v15 = vpop.f32.mrb[23].mxu0  ;;  %1469 = vmatmul.mubr.msk.bf16.gmra.mrb[16].mxu1 %vm205_vm0, %v664_v33  ;;  %v613_v51 = vmax.f32 %v425_v10, 0.0 }
 0x164   :  { %v420_v63 = vadd.f32 %v1989_v34, %v419_v15  ;;  %v611_v40 = vmax.f32 %v417_v46, 0.0 }
 0x165   :  { %v614_v58 = vmax.f32 %v428_v52, 0.0 }
 0x166   :  { %v612_v39 = vmax.f32 %v420_v63, 0.0 }
 0x167   :  { %v666_v22 = vpack.c.bf16 %v614_v58, %v613_v51 }
 0x168   :  { %v665_v45 = vpack.c.bf16 %v612_v39, %v611_v40  ;;  %v1410_v27 = vpop.f32.mrb[24].mxu0 }
 0x169   :  { %v441_v16 = vadd.f32 %v1410_v27, %v1989_v34  ;;  %v432_v0 = vpop.f32.mrb[25].mxu0 }
 0x16a   :  { %v433_v57 = vadd.f32 %v1989_v34, %v432_v0  ;;  %v1411_v9 = vpop.f32.mrb[26].mxu0  ;;  %1472 = vmatprep.mubr.msk.bf16.mxu1 %vm205_vm0, %v665_v45 }
 0x16b   :  { %v444_v28 = vadd.f32 %v1411_v9, %v1989_v34  ;;  %v435_v33 = vpop.f32.mrb[27].mxu0  ;;  %1473 = vmatmul.mubr.msk.bf16.gmra.mrb[20].mxu1 %vm205_vm0, %v666_v22  ;;  %v617_v46 = vmax.f32 %v441_v16, 0.0 }
 0x16c   :  { %v436_v10 = vadd.f32 %v1989_v34, %v435_v33  ;;  %v615_v15 = vmax.f32 %v433_v57, 0.0 }
 0x16d   :  { %v618_v52 = vmax.f32 %v444_v28, 0.0 }
 0x16e   :  { %v616_v63 = vmax.f32 %v436_v10, 0.0 }
 0x16f   :  { %v668_v51 = vpack.c.bf16 %v618_v52, %v617_v46 }
 0x170   :  { %v667_v58 = vpack.c.bf16 %v616_v63, %v615_v15  ;;  %v1414_v40 = vpop.f32.mrb[28].mxu0 }
 0x171   :  { %v457_v39 = vadd.f32 %v1414_v40, %v1989_v34  ;;  %v448_v27 = vpop.f32.mrb[29].mxu0 }
 0x172   :  { %v449_v0 = vadd.f32 %v1989_v34, %v448_v27  ;;  %v1415_v45 = vpop.f32.mrb[30].mxu0  ;;  %1476 = vmatprep.mubr.msk.bf16.mxu1 %vm205_vm0, %v667_v58 }
 0x173   :  { %v460_v9 = vadd.f32 %v1415_v45, %v1989_v34  ;;  %v451_v22 = vpop.f32.mrb[31].mxu0  ;;  %1477 = vmatmul.mubr.msk.bf16.gmra.mrb[24].mxu1 %vm205_vm0, %v668_v51  ;;  %v621_v57 = vmax.f32 %v457_v39, 0.0 }
 0x174   :  { %v452_v16 = vadd.f32 %v1989_v34, %v451_v22  ;;  %v619_v33 = vmax.f32 %v449_v0, 0.0 }
 0x175   :  { %v622_v28 = vmax.f32 %v460_v9, 0.0 }
 0x176   :  { %v620_v10 = vmax.f32 %v452_v16, 0.0 }
 0x177   :  { %v670_v46 = vpack.c.bf16 %v622_v28, %v621_v57 }
 0x178   :  { %v669_v52 = vpack.c.bf16 %v620_v10, %v619_v33  ;;  %v1418_v15 = vpop.f32.mrb[32].mxu0 }
 0x179   :  { %v473_v63 = vadd.f32 %v1418_v15, %v1989_v34  ;;  %v464_v40 = vpop.f32.mrb[33].mxu0 }
 0x17a   :  { %v465_v27 = vadd.f32 %v1989_v34, %v464_v40  ;;  %v1419_v58 = vpop.f32.mrb[34].mxu0  ;;  %1480 = vmatprep.mubr.msk.bf16.mxu1 %vm205_vm0, %v669_v52 }
 0x17b   :  { %v476_v45 = vadd.f32 %v1419_v58, %v1989_v34  ;;  %v467_v51 = vpop.f32.mrb[35].mxu0  ;;  %1481 = vmatmul.mubr.msk.bf16.gmra.mrb[28].mxu1 %vm205_vm0, %v670_v46  ;;  %v625_v0 = vmax.f32 %v473_v63, 0.0 }
 0x17c   :  { %v468_v39 = vadd.f32 %v1989_v34, %v467_v51  ;;  %v623_v22 = vmax.f32 %v465_v27, 0.0 }
 0x17d   :  { %v626_v9 = vmax.f32 %v476_v45, 0.0 }
 0x17e   :  { %v624_v16 = vmax.f32 %v468_v39, 0.0 }
 0x17f   :  { %v672_v57 = vpack.c.bf16 %v626_v9, %v625_v0 }
 0x180   :  { %v671_v28 = vpack.c.bf16 %v624_v16, %v623_v22  ;;  %v1422_v33 = vpop.f32.mrb[36].mxu0 }
 0x181   :  { %v489_v10 = vadd.f32 %v1422_v33, %v1989_v34  ;;  %v480_v15 = vpop.f32.mrb[37].mxu0 }
 0x182   :  { %v481_v40 = vadd.f32 %v1989_v34, %v480_v15  ;;  %v1423_v52 = vpop.f32.mrb[38].mxu0  ;;  %1484 = vmatprep.mubr.msk.bf16.mxu1 %vm205_vm0, %v671_v28 }
 0x183   :  { %v492_v58 = vadd.f32 %v1423_v52, %v1989_v34  ;;  %v483_v46 = vpop.f32.mrb[39].mxu0  ;;  %1485 = vmatmul.mubr.msk.bf16.gmra.mrb[32].mxu1 %vm205_vm0, %v672_v57  ;;  %v629_v27 = vmax.f32 %v489_v10, 0.0 }
 0x184   :  { %v484_v63 = vadd.f32 %v1989_v34, %v483_v46  ;;  %v627_v51 = vmax.f32 %v481_v40, 0.0 }
 0x185   :  { %v630_v45 = vmax.f32 %v492_v58, 0.0 }
 0x186   :  { %v628_v39 = vmax.f32 %v484_v63, 0.0 }
 0x187   :  { %v674_v0 = vpack.c.bf16 %v630_v45, %v629_v27 }
 0x188   :  { %v673_v9 = vpack.c.bf16 %v628_v39, %v627_v51  ;;  %v1426_v22 = vpop.f32.mrb[40].mxu0 }
 0x189   :  { %v505_v16 = vadd.f32 %v1426_v22, %v1989_v34  ;;  %v496_v33 = vpop.f32.mrb[41].mxu0 }
 0x18a   :  { %v497_v15 = vadd.f32 %v1989_v34, %v496_v33  ;;  %v1427_v28 = vpop.f32.mrb[42].mxu0  ;;  %1488 = vmatprep.mubr.msk.bf16.mxu1 %vm205_vm0, %v673_v9 }
 0x18b   :  { %v508_v52 = vadd.f32 %v1427_v28, %v1989_v34  ;;  %v499_v57 = vpop.f32.mrb[43].mxu0  ;;  %1489 = vmatmul.mubr.msk.bf16.gmra.mrb[36].mxu1 %vm205_vm0, %v674_v0  ;;  %v633_v40 = vmax.f32 %v505_v16, 0.0 }
 0x18c   :  { %v500_v10 = vadd.f32 %v1989_v34, %v499_v57  ;;  %v631_v46 = vmax.f32 %v497_v15, 0.0 }
 0x18d   :  { %v634_v58 = vmax.f32 %v508_v52, 0.0 }
 0x18e   :  { %v632_v63 = vmax.f32 %v500_v10, 0.0 }
 0x18f   :  { %v676_v27 = vpack.c.bf16 %v634_v58, %v633_v40 }
 0x190   :  { %v675_v45 = vpack.c.bf16 %v632_v63, %v631_v46  ;;  %v1430_v51 = vpop.f32.mrb[44].mxu0 }
 0x191   :  { %v521_v39 = vadd.f32 %v1430_v51, %v1989_v34  ;;  %v512_v22 = vpop.f32.mrb[45].mxu0 }
 0x192   :  { %v513_v33 = vadd.f32 %v1989_v34, %v512_v22  ;;  %v1431_v9 = vpop.f32.mrb[46].mxu0  ;;  %1492 = vmatprep.mubr.msk.bf16.mxu1 %vm205_vm0, %v675_v45 }
 0x193   :  { %v524_v28 = vadd.f32 %v1431_v9, %v1989_v34  ;;  %v515_v0 = vpop.f32.mrb[47].mxu0  ;;  %1493 = vmatmul.mubr.msk.bf16.gmra.mrb[40].mxu1 %vm205_vm0, %v676_v27  ;;  %v637_v15 = vmax.f32 %v521_v39, 0.0 }
 0x194   :  { %v516_v16 = vadd.f32 %v1989_v34, %v515_v0  ;;  %v635_v57 = vmax.f32 %v513_v33, 0.0 }
 0x195   :  { %v638_v52 = vmax.f32 %v524_v28, 0.0 }
 0x196   :  { %v636_v10 = vmax.f32 %v516_v16, 0.0 }
 0x197   :  { %v678_v40 = vpack.c.bf16 %v638_v52, %v637_v15 }
 0x198   :  { %v677_v58 = vpack.c.bf16 %v636_v10, %v635_v57  ;;  %v1434_v46 = vpop.f32.mrb[48].mxu0 }
 0x199   :  { %v537_v63 = vadd.f32 %v1434_v46, %v1989_v34  ;;  %v528_v51 = vpop.f32.mrb[49].mxu0 }
 0x19a   :  { %v529_v22 = vadd.f32 %v1989_v34, %v528_v51  ;;  %v1435_v45 = vpop.f32.mrb[50].mxu0  ;;  %1496 = vmatprep.mubr.msk.bf16.mxu1 %vm205_vm0, %v677_v58 }
 0x19b   :  { %v540_v9 = vadd.f32 %v1435_v45, %v1989_v34  ;;  %v531_v27 = vpop.f32.mrb[51].mxu0  ;;  %1497 = vmatmul.mubr.msk.bf16.gmra.mrb[44].mxu1 %vm205_vm0, %v678_v40  ;;  %v641_v33 = vmax.f32 %v537_v63, 0.0 }
 0x19c   :  { %v532_v39 = vadd.f32 %v1989_v34, %v531_v27  ;;  %v639_v0 = vmax.f32 %v529_v22, 0.0 }
 0x19d   :  { %v642_v28 = vmax.f32 %v540_v9, 0.0 }
 0x19e   :  { %v640_v16 = vmax.f32 %v532_v39, 0.0 }
 0x19f   :  { %v680_v15 = vpack.c.bf16 %v642_v28, %v641_v33 }
 0x1a0   :  { %v679_v52 = vpack.c.bf16 %v640_v16, %v639_v0  ;;  %v1438_v57 = vpop.f32.mrb[52].mxu0 }
 0x1a1   :  { %v553_v10 = vadd.f32 %v1438_v57, %v1989_v34  ;;  %v544_v46 = vpop.f32.mrb[53].mxu0 }
 0x1a2   :  { %v545_v51 = vadd.f32 %v1989_v34, %v544_v46  ;;  %v1439_v58 = vpop.f32.mrb[54].mxu0  ;;  %1500 = vmatprep.mubr.msk.bf16.mxu1 %vm205_vm0, %v679_v52 }
 0x1a3   :  { %v556_v45 = vadd.f32 %v1439_v58, %v1989_v34  ;;  %v547_v40 = vpop.f32.mrb[55].mxu0  ;;  %1501 = vmatmul.mubr.msk.bf16.gmra.mrb[48].mxu1 %vm205_vm0, %v680_v15  ;;  %v645_v22 = vmax.f32 %v553_v10, 0.0 }
 0x1a4   :  { %v548_v63 = vadd.f32 %v1989_v34, %v547_v40  ;;  %v643_v27 = vmax.f32 %v545_v51, 0.0 }
 0x1a5   :  { %v646_v9 = vmax.f32 %v556_v45, 0.0 }
 0x1a6   :  { %v644_v39 = vmax.f32 %v548_v63, 0.0 }
 0x1a7   :  { %v682_v33 = vpack.c.bf16 %v646_v9, %v645_v22 }
 0x1a8   :  { %v681_v28 = vpack.c.bf16 %v644_v39, %v643_v27  ;;  %v1442_v0 = vpop.f32.mrb[56].mxu0 }
 0x1a9   :  { %v569_v16 = vadd.f32 %v1442_v0, %v1989_v34  ;;  %v560_v57 = vpop.f32.mrb[57].mxu0 }
 0x1aa   :  { %v561_v46 = vadd.f32 %v1989_v34, %v560_v57  ;;  %v1443_v52 = vpop.f32.mrb[58].mxu0  ;;  %1504 = vmatprep.mubr.msk.bf16.mxu1 %vm205_vm0, %v681_v28 }
 0x1ab   :  { %v572_v58 = vadd.f32 %v1443_v52, %v1989_v34  ;;  %v563_v15 = vpop.f32.mrb[59].mxu0  ;;  %1505 = vmatmul.mubr.msk.bf16.gmra.mrb[52].mxu1 %vm205_vm0, %v682_v33  ;;  %v649_v51 = vmax.f32 %v569_v16, 0.0 }
 0x1ac   :  { %v564_v10 = vadd.f32 %v1989_v34, %v563_v15  ;;  %v647_v40 = vmax.f32 %v561_v46, 0.0 }
 0x1ad   :  { %v650_v45 = vmax.f32 %v572_v58, 0.0 }
 0x1ae   :  { %v648_v63 = vmax.f32 %v564_v10, 0.0 }
 0x1af   :  { %v684_v22 = vpack.c.bf16 %v650_v45, %v649_v51 }
 0x1b0   :  { %v683_v9 = vpack.c.bf16 %v648_v63, %v647_v40  ;;  %v1446_v27 = vpop.f32.mrb[60].mxu0  ;;  %v2087_v40 = vld [vmem:[#allocation10] ss:$0 sm:$0xff] }
 0x1b1   :  { %v585_v39 = vadd.f32 %v1446_v27, %v1989_v34  ;;  %v576_v0 = vpop.f32.mrb[61].mxu0 }
 0x1b2   :  { %v577_v57 = vadd.f32 %v1989_v34, %v576_v0  ;;  %v1447_v28 = vpop.f32.mrb[62].mxu0  ;;  %1508 = vmatprep.mubr.msk.bf16.mxu1 %vm205_vm0, %v683_v9 }
 0x1b3   :  { %v588_v52 = vadd.f32 %v1447_v28, %v1989_v34  ;;  %v579_v33 = vpop.f32.mrb[63].mxu0  ;;  %1509 = vmatmul.mubr.msk.bf16.gmra.mrb[56].mxu1 %vm205_vm0, %v684_v22  ;;  %v653_v46 = vmax.f32 %v585_v39, 0.0 }
 0x1b4   :  { %v580_v16 = vadd.f32 %v1989_v34, %v579_v33  ;;  %v651_v15 = vmax.f32 %v577_v57, 0.0 }
 0x1b5   :  { %v654_v58 = vmax.f32 %v588_v52, 0.0 }
 0x1b6   :  { %v652_v10 = vmax.f32 %v580_v16, 0.0 }
 0x1b7   :  { %v686_v51 = vpack.c.bf16 %v654_v58, %v653_v46 }
 0x1b8   :  { %v685_v45 = vpack.c.bf16 %v652_v10, %v651_v15 }
 0x1ba   :  { %1512 = vmatprep.mubr.msk.bf16.mxu1 %vm205_vm0, %v685_v45 }
 0x1bb   :  { %1513 = vmatmul.mubr.msk.bf16.gmra.mrb[60].mxu1 %vm205_vm0, %v686_v51 }
 0x216   :  { %v1454_v63 = vpop.f32.mrb[0].mxu1 }
 0x217   :  { %v849_v9 = vadd.f32 %v1454_v63, %v2087_v40  ;;  %v840_v27 = vpop.f32.mrb[1].mxu1 }
 0x218   :  { %v841_v22 = vadd.f32 %v2087_v40, %v840_v27  ;;  %v1455_v0 = vpop.f32.mrb[2].mxu1 }
 0x219   :  { %v1097_v34 = vadd.f32 %v849_v9, %v1783_v5  ;;  %v852_v39 = vadd.f32 %v1455_v0, %v2087_v40  ;;  %v843_v57 = vpop.f32.mrb[3].mxu1 }
 0x21a   :  { %v1095_v28 = vadd.f32 %v841_v22, %v1777_v2  ;;  %v844_v52 = vadd.f32 %v2087_v40, %v843_v57 }
 0x21b   :  { %1161 = vst.msk [vmem:[#allocation11 + $0x10] sm:$0xff] %vm205_vm0, %v1097_v34  ;;  %v1098_v33 = vadd.f32 %v852_v39, %v1785_v6 }
 0x21c   :  { %1159 = vst.msk [vmem:[#allocation11] sm:$0xff] %vm205_vm0, %v1095_v28  ;;  %v1096_v16 = vadd.f32 %v844_v52, %v1779_v3 }
 0x21d   :  { %1162 = vst.msk [vmem:[#allocation11 + $0x18] sm:$0xff] %vm205_vm0, %v1098_v33 }
 0x21e   :  { %1160 = vst.msk [vmem:[#allocation11 + $0x8] sm:$0xff] %vm205_vm0, %v1096_v16  ;;  %v1458_v5 = vpop.f32.mrb[4].mxu1 }
 0x21f   :  { %v865_v46 = vadd.f32 %v1458_v5, %v2087_v40  ;;  %v856_v58 = vpop.f32.mrb[5].mxu1 }
 0x220   :  { %v857_v2 = vadd.f32 %v2087_v40, %v856_v58  ;;  %v1459_v15 = vpop.f32.mrb[6].mxu1 }
 0x221   :  { %v1101_v10 = vadd.f32 %v865_v46, %v1798_v11  ;;  %v868_v51 = vadd.f32 %v1459_v15, %v2087_v40  ;;  %v859_v6 = vpop.f32.mrb[7].mxu1 }
 0x222   :  { %v1099_v45 = vadd.f32 %v857_v2, %v1787_v7  ;;  %v860_v3 = vadd.f32 %v2087_v40, %v859_v6 }
 0x223   :  { %1165 = vst.msk [vmem:[#allocation11 + $0x30] sm:$0xff] %vm205_vm0, %v1101_v10  ;;  %v1102_v63 = vadd.f32 %v868_v51, %v1800_v12 }
 0x224   :  { %1163 = vst.msk [vmem:[#allocation11 + $0x20] sm:$0xff] %vm205_vm0, %v1099_v45  ;;  %v1100_v9 = vadd.f32 %v860_v3, %v1789_v8 }
 0x225   :  { %1166 = vst.msk [vmem:[#allocation11 + $0x38] sm:$0xff] %vm205_vm0, %v1102_v63 }
 0x226   :  { %1164 = vst.msk [vmem:[#allocation11 + $0x28] sm:$0xff] %vm205_vm0, %v1100_v9  ;;  %v1462_v11 = vpop.f32.mrb[8].mxu1 }
 0x227   :  { %v881_v27 = vadd.f32 %v1462_v11, %v2087_v40  ;;  %v872_v22 = vpop.f32.mrb[9].mxu1 }
 0x228   :  { %v873_v7 = vadd.f32 %v2087_v40, %v872_v22  ;;  %v1463_v0 = vpop.f32.mrb[10].mxu1 }
 0x229   :  { %v1105_v34 = vadd.f32 %v881_v27, %v1812_v17  ;;  %v884_v39 = vadd.f32 %v1463_v0, %v2087_v40  ;;  %v875_v12 = vpop.f32.mrb[11].mxu1 }
 0x22a   :  { %v1103_v57 = vadd.f32 %v873_v7, %v1802_v13  ;;  %v876_v8 = vadd.f32 %v2087_v40, %v875_v12 }
 0x22b   :  { %1169 = vst.msk [vmem:[#allocation11 + $0x50] sm:$0xff] %vm205_vm0, %v1105_v34  ;;  %v1106_v28 = vadd.f32 %v884_v39, %v1814_v18 }
 0x22c   :  { %1167 = vst.msk [vmem:[#allocation11 + $0x40] sm:$0xff] %vm205_vm0, %v1103_v57  ;;  %v1104_v52 = vadd.f32 %v876_v8, %v1804_v14 }
 0x22d   :  { %1170 = vst.msk [vmem:[#allocation11 + $0x58] sm:$0xff] %vm205_vm0, %v1106_v28 }
 0x22e   :  { %1168 = vst.msk [vmem:[#allocation11 + $0x48] sm:$0xff] %vm205_vm0, %v1104_v52  ;;  %v1466_v17 = vpop.f32.mrb[12].mxu1 }
 0x22f   :  { %v897_v33 = vadd.f32 %v1466_v17, %v2087_v40  ;;  %v888_v16 = vpop.f32.mrb[13].mxu1 }
 0x230   :  { %v889_v13 = vadd.f32 %v2087_v40, %v888_v16  ;;  %v1467_v5 = vpop.f32.mrb[14].mxu1 }
 0x231   :  { %v1109_v46 = vadd.f32 %v897_v33, %v1826_v23  ;;  %v900_v58 = vadd.f32 %v1467_v5, %v2087_v40  ;;  %v891_v18 = vpop.f32.mrb[15].mxu1 }
 0x232   :  { %v1107_v2 = vadd.f32 %v889_v13, %v1816_v19  ;;  %v892_v14 = vadd.f32 %v2087_v40, %v891_v18 }
 0x233   :  { %1173 = vst.msk [vmem:[#allocation11 + $0x70] sm:$0xff] %vm205_vm0, %v1109_v46  ;;  %v1110_v15 = vadd.f32 %v900_v58, %v1828_v24 }
 0x234   :  { %1171 = vst.msk [vmem:[#allocation11 + $0x60] sm:$0xff] %vm205_vm0, %v1107_v2  ;;  %v1108_v10 = vadd.f32 %v892_v14, %v1818_v20 }
 0x235   :  { %1174 = vst.msk [vmem:[#allocation11 + $0x78] sm:$0xff] %vm205_vm0, %v1110_v15 }
 0x236   :  { %1172 = vst.msk [vmem:[#allocation11 + $0x68] sm:$0xff] %vm205_vm0, %v1108_v10  ;;  %v1470_v23 = vpop.f32.mrb[16].mxu1 }
 0x237   :  { %v913_v51 = vadd.f32 %v1470_v23, %v2087_v40  ;;  %v904_v6 = vpop.f32.mrb[17].mxu1 }
 0x238   :  { %v905_v19 = vadd.f32 %v2087_v40, %v904_v6  ;;  %v1471_v45 = vpop.f32.mrb[18].mxu1 }
 0x239   :  { %v1113_v3 = vadd.f32 %v913_v51, %v1840_v29  ;;  %v916_v63 = vadd.f32 %v1471_v45, %v2087_v40  ;;  %v907_v24 = vpop.f32.mrb[19].mxu1 }
 0x23a   :  { %v1111_v9 = vadd.f32 %v905_v19, %v1830_v25  ;;  %v908_v20 = vadd.f32 %v2087_v40, %v907_v24 }
 0x23b   :  { %1177 = vst.msk [vmem:[#allocation11 + $0x90] sm:$0xff] %vm205_vm0, %v1113_v3  ;;  %v1114_v11 = vadd.f32 %v916_v63, %v1842_v30 }
 0x23c   :  { %1175 = vst.msk [vmem:[#allocation11 + $0x80] sm:$0xff] %vm205_vm0, %v1111_v9  ;;  %v1112_v27 = vadd.f32 %v908_v20, %v1832_v26 }
 0x23d   :  { %1178 = vst.msk [vmem:[#allocation11 + $0x98] sm:$0xff] %vm205_vm0, %v1114_v11 }
 0x23e   :  { %1176 = vst.msk [vmem:[#allocation11 + $0x88] sm:$0xff] %vm205_vm0, %v1112_v27  ;;  %v1474_v29 = vpop.f32.mrb[20].mxu1 }
 0x23f   :  { %v929_v22 = vadd.f32 %v1474_v29, %v2087_v40  ;;  %v920_v7 = vpop.f32.mrb[21].mxu1 }
 0x240   :  { %v921_v25 = vadd.f32 %v2087_v40, %v920_v7  ;;  %v1475_v0 = vpop.f32.mrb[22].mxu1 }
 0x241   :  { %v1117_v34 = vadd.f32 %v929_v22, %v1854_v35  ;;  %v932_v39 = vadd.f32 %v1475_v0, %v2087_v40  ;;  %v923_v30 = vpop.f32.mrb[23].mxu1 }
 0x242   :  { %v1115_v12 = vadd.f32 %v921_v25, %v1844_v31  ;;  %v924_v26 = vadd.f32 %v2087_v40, %v923_v30 }
 0x243   :  { %1181 = vst.msk [vmem:[#allocation11 + $0xb0] sm:$0xff] %vm205_vm0, %v1117_v34  ;;  %v1118_v57 = vadd.f32 %v932_v39, %v1856_v36 }
 0x244   :  { %1179 = vst.msk [vmem:[#allocation11 + $0xa0] sm:$0xff] %vm205_vm0, %v1115_v12  ;;  %v1116_v8 = vadd.f32 %v924_v26, %v1846_v32 }
 0x245   :  { %1182 = vst.msk [vmem:[#allocation11 + $0xb8] sm:$0xff] %vm205_vm0, %v1118_v57 }
 0x246   :  { %1180 = vst.msk [vmem:[#allocation11 + $0xa8] sm:$0xff] %vm205_vm0, %v1116_v8  ;;  %v1478_v35 = vpop.f32.mrb[24].mxu1 }
 0x247   :  { %v945_v28 = vadd.f32 %v1478_v35, %v2087_v40  ;;  %v936_v52 = vpop.f32.mrb[25].mxu1 }
 0x248   :  { %v937_v31 = vadd.f32 %v2087_v40, %v936_v52  ;;  %v1479_v17 = vpop.f32.mrb[26].mxu1 }
 0x249   :  { %v1121_v33 = vadd.f32 %v945_v28, %v1868_v41  ;;  %v948_v16 = vadd.f32 %v1479_v17, %v2087_v40  ;;  %v939_v36 = vpop.f32.mrb[27].mxu1 }
 0x24a   :  { %v1119_v13 = vadd.f32 %v937_v31, %v1858_v37  ;;  %v940_v32 = vadd.f32 %v2087_v40, %v939_v36  ;;  %v2328_v36 = vld [vmem:[#allocation16_spill] sm:$0xff] }
 0x24b   :  { %1185 = vst.msk [vmem:[#allocation11 + $0xd0] sm:$0xff] %vm205_vm0, %v1121_v33  ;;  %v1122_v5 = vadd.f32 %v948_v16, %v1870_v42 }
 0x24c   :  { %1183 = vst.msk [vmem:[#allocation11 + $0xc0] sm:$0xff] %vm205_vm0, %v1119_v13  ;;  %v1120_v46 = vadd.f32 %v940_v32, %v1860_v38  ;;  %v2329_v32 = vld [vmem:[#allocation18_spill] sm:$0xff] }
 0x24d   :  { %1186 = vst.msk [vmem:[#allocation11 + $0xd8] sm:$0xff] %vm205_vm0, %v1122_v5 }
 0x24e   :  { %1184 = vst.msk [vmem:[#allocation11 + $0xc8] sm:$0xff] %vm205_vm0, %v1120_v46  ;;  %v1482_v41 = vpop.f32.mrb[28].mxu1  ;;  %v2330_v46 = vld [vmem:[#allocation17_spill] sm:$0xff] }
 0x24f   :  { %v961_v58 = vadd.f32 %v1482_v41, %v2087_v40  ;;  %v952_v18 = vpop.f32.mrb[29].mxu1 }
 0x250   :  { %v953_v37 = vadd.f32 %v2087_v40, %v952_v18  ;;  %v1483_v2 = vpop.f32.mrb[30].mxu1 }
 0x251   :  { %v1125_v14 = vadd.f32 %v961_v58, %v1882_v47  ;;  %v964_v15 = vadd.f32 %v1483_v2, %v2087_v40  ;;  %v955_v42 = vpop.f32.mrb[31].mxu1 }
 0x252   :  { %v1123_v10 = vadd.f32 %v953_v37, %v1872_v43  ;;  %v956_v38 = vadd.f32 %v2087_v40, %v955_v42 }
 0x253   :  { %1189 = vst.msk [vmem:[#allocation11 + $0xf0] sm:$0xff] %vm205_vm0, %v1125_v14  ;;  %v1126_v23 = vadd.f32 %v964_v15, %v1884_v48  ;;  %v2331_v14 = vld [vmem:[#allocation21_spill] sm:$0xff] }
 0x254   :  { %1187 = vst.msk [vmem:[#allocation11 + $0xe0] sm:$0xff] %vm205_vm0, %v1123_v10  ;;  %v1124_v51 = vadd.f32 %v956_v38, %v1874_v44  ;;  %v2332_v38 = vld [vmem:[#allocation19_spill] sm:$0xff] }
 0x255   :  { %1190 = vst.msk [vmem:[#allocation11 + $0xf8] sm:$0xff] %vm205_vm0, %v1126_v23 }
 0x256   :  { %1188 = vst.msk [vmem:[#allocation11 + $0xe8] sm:$0xff] %vm205_vm0, %v1124_v51  ;;  %v1486_v47 = vpop.f32.mrb[32].mxu1 }
 0x257   :  { %v977_v6 = vadd.f32 %v1486_v47, %v2087_v40  ;;  %v968_v19 = vpop.f32.mrb[33].mxu1  ;;  %v2333_v47 = vld [vmem:[#allocation22_spill] sm:$0xff] }
 0x258   :  { %v969_v43 = vadd.f32 %v2087_v40, %v968_v19  ;;  %v1487_v45 = vpop.f32.mrb[34].mxu1  ;;  %v2334_v19 = vld [vmem:[#allocation20_spill] sm:$0xff] }
 0x259   :  { %v1129_v3 = vadd.f32 %v977_v6, %v1896_v53  ;;  %v980_v63 = vadd.f32 %v1487_v45, %v2087_v40  ;;  %v971_v48 = vpop.f32.mrb[35].mxu1 }
 0x25a   :  { %v1127_v24 = vadd.f32 %v969_v43, %v1886_v49  ;;  %v972_v44 = vadd.f32 %v2087_v40, %v971_v48 }
 0x25b   :  { %1193 = vst.msk [vmem:[#allocation11 + $0x110] sm:$0xff] %vm205_vm0, %v1129_v3  ;;  %v1130_v9 = vadd.f32 %v980_v63, %v1898_v54 }
 0x25c   :  { %1191 = vst.msk [vmem:[#allocation11 + $0x100] sm:$0xff] %vm205_vm0, %v1127_v24  ;;  %v1128_v20 = vadd.f32 %v972_v44, %v1888_v50  ;;  %v2335_v44 = vld [vmem:[#allocation25_spill] sm:$0xff] }
 0x25d   :  { %1194 = vst.msk [vmem:[#allocation11 + $0x118] sm:$0xff] %vm205_vm0, %v1130_v9 }
 0x25e   :  { %1192 = vst.msk [vmem:[#allocation11 + $0x108] sm:$0xff] %vm205_vm0, %v1128_v20  ;;  %v1490_v53 = vpop.f32.mrb[36].mxu1 }
 0x25f   :  { %v993_v11 = vadd.f32 %v1490_v53, %v2087_v40  ;;  %v984_v27 = vpop.f32.mrb[37].mxu1 }
 0x260   :  { %v985_v49 = vadd.f32 %v2087_v40, %v984_v27  ;;  %v1491_v29 = vpop.f32.mrb[38].mxu1 }
 0x261   :  { %v1133_v22 = vadd.f32 %v993_v11, %v1910_v59  ;;  %v996_v7 = vadd.f32 %v1491_v29, %v2087_v40  ;;  %v987_v54 = vpop.f32.mrb[39].mxu1  ;;  %v2336_v11 = vld [vmem:[#allocation23_spill] sm:$0xff]  ;;  %v2337_v29 = vld [vmem:[#allocation26_spill] sm:$0xff] }
 0x262   :  { %v1131_v25 = vadd.f32 %v985_v49, %v1900_v55  ;;  %v988_v50 = vadd.f32 %v2087_v40, %v987_v54 }
 0x263   :  { %1197 = vst.msk [vmem:[#allocation11 + $0x130] sm:$0xff] %vm205_vm0, %v1133_v22  ;;  %v1134_v0 = vadd.f32 %v996_v7, %v1912_v60  ;;  %v2338_v7 = vld [vmem:[#allocation24_spill] sm:$0xff] }
 0x264   :  { %1195 = vst.msk [vmem:[#allocation11 + $0x120] sm:$0xff] %vm205_vm0, %v1131_v25  ;;  %v1132_v34 = vadd.f32 %v988_v50, %v1902_v56 }
 0x265   :  { %1198 = vst.msk [vmem:[#allocation11 + $0x138] sm:$0xff] %vm205_vm0, %v1134_v0 }
 0x266   :  { %1196 = vst.msk [vmem:[#allocation11 + $0x128] sm:$0xff] %vm205_vm0, %v1132_v34  ;;  %v1494_v59 = vpop.f32.mrb[40].mxu1 }
 0x267   :  { %v1009_v39 = vadd.f32 %v1494_v59, %v2087_v40  ;;  %v1000_v30 = vpop.f32.mrb[41].mxu1 }
 0x268   :  { %v1001_v55 = vadd.f32 %v2087_v40, %v1000_v30  ;;  %v1495_v12 = vpop.f32.mrb[42].mxu1 }
 0x269   :  { %v1137_v26 = vadd.f32 %v1009_v39, %v1924_v1  ;;  %v1012_v57 = vadd.f32 %v1495_v12, %v2087_v40  ;;  %v1003_v60 = vpop.f32.mrb[43].mxu1  ;;  %v2339_v39 = vld [vmem:[#allocation28_spill] sm:$0xff] }
 0x26a   :  { %v1135_v8 = vadd.f32 %v1001_v55, %v1914_v61  ;;  %v1004_v56 = vadd.f32 %v2087_v40, %v1003_v60 }
 0x26b   :  { %1201 = vst.msk [vmem:[#allocation11 + $0x150] sm:$0xff] %vm205_vm0, %v1137_v26  ;;  %v1138_v35 = vadd.f32 %v1012_v57, %v1926_v4  ;;  %v2340_v26 = vld [vmem:[#allocation27_spill] sm:$0xff] }
 0x26c   :  { %1199 = vst.msk [vmem:[#allocation11 + $0x140] sm:$0xff] %vm205_vm0, %v1135_v8  ;;  %v1136_v28 = vadd.f32 %v1004_v56, %v1916_v62  ;;  %v2341_v8 = vld [vmem:[#allocation29_spill] sm:$0xff] }
 0x26d   :  { %1202 = vst.msk [vmem:[#allocation11 + $0x158] sm:$0xff] %vm205_vm0, %v1138_v35  ;;  %v1530_v35 = vld [vmem:[#allocation2 + $0x1c8] sm:$0xff] }
 0x26e   :  { %1200 = vst.msk [vmem:[#allocation11 + $0x148] sm:$0xff] %vm205_vm0, %v1136_v28  ;;  %v1498_v1 = vpop.f32.mrb[44].mxu1 }
 0x26f   :  { %v1025_v52 = vadd.f32 %v1498_v1, %v2087_v40  ;;  %v1016_v31 = vpop.f32.mrb[45].mxu1 }
 0x270   :  { %v1017_v61 = vadd.f32 %v2087_v40, %v1016_v31  ;;  %v1499_v17 = vpop.f32.mrb[46].mxu1 }
 0x271   :  { %v1141_v33 = vadd.f32 %v1025_v52, %v1938_v21  ;;  %v1028_v16 = vadd.f32 %v1499_v17, %v2087_v40  ;;  %v1019_v4 = vpop.f32.mrb[47].mxu1 }
 0x272   :  { %v1139_v13 = vadd.f32 %v1017_v61, %v2328_v36  ;;  %v1020_v62 = vadd.f32 %v2087_v40, %v1019_v4 }
 0x273   :  { %1205 = vst.msk [vmem:[#allocation11 + $0x170] sm:$0xff] %vm205_vm0, %v1141_v33  ;;  %v1142_v5 = vadd.f32 %v1028_v16, %v2329_v32  ;;  %v2342_v33 = vld [vmem:[#allocation30_spill] sm:$0xff] }
 0x274   :  { %1203 = vst.msk [vmem:[#allocation11 + $0x160] sm:$0xff] %vm205_vm0, %v1139_v13  ;;  %v1140_v41 = vadd.f32 %v1020_v62, %v2330_v46  ;;  %v1531_v13 = vld [vmem:[#allocation2 + $0x1e0] sm:$0xff] }
 0x275   :  { %1206 = vst.msk [vmem:[#allocation11 + $0x178] sm:$0xff] %vm205_vm0, %v1142_v5  ;;  %v1532_v5 = vld [vmem:[#allocation2 + $0x1f8] sm:$0xff] }
 0x276   :  { %1204 = vst.msk [vmem:[#allocation11 + $0x168] sm:$0xff] %vm205_vm0, %v1140_v41  ;;  %v1502_v21 = vpop.f32.mrb[48].mxu1  ;;  %v1533_v41 = vld [vmem:[#allocation2 + $0x1e8] sm:$0xff] }
 0x277   :  { %v1041_v58 = vadd.f32 %v1502_v21, %v2087_v40  ;;  %v1032_v18 = vpop.f32.mrb[49].mxu1 }
 0x278   :  { %v1033_v37 = vadd.f32 %v2087_v40, %v1032_v18  ;;  %v1503_v2 = vpop.f32.mrb[50].mxu1 }
 0x279   :  { %v1145_v15 = vadd.f32 %v1041_v58, %v2331_v14  ;;  %v1044_v42 = vadd.f32 %v1503_v2, %v2087_v40  ;;  %v1035_v10 = vpop.f32.mrb[51].mxu1 }
 0x27a   :  { %v1143_v23 = vadd.f32 %v1033_v37, %v2332_v38  ;;  %v1036_v51 = vadd.f32 %v2087_v40, %v1035_v10 }
 0x27b   :  { %1209 = vst.msk [vmem:[#allocation11 + $0x190] sm:$0xff] %vm205_vm0, %v1145_v15  ;;  %v1146_v6 = vadd.f32 %v1044_v42, %v2333_v47 }
 0x27c   :  { %1207 = vst.msk [vmem:[#allocation11 + $0x180] sm:$0xff] %vm205_vm0, %v1143_v23  ;;  %v1144_v43 = vadd.f32 %v1036_v51, %v2334_v19 }
 0x27d   :  { %1210 = vst.msk [vmem:[#allocation11 + $0x198] sm:$0xff] %vm205_vm0, %v1146_v6 }
 0x27e   :  { %1208 = vst.msk [vmem:[#allocation11 + $0x188] sm:$0xff] %vm205_vm0, %v1144_v43  ;;  %v1506_v45 = vpop.f32.mrb[52].mxu1 }
 0x27f   :  { %v1057_v3 = vadd.f32 %v1506_v45, %v2087_v40  ;;  %v1048_v63 = vpop.f32.mrb[53].mxu1 }
 0x280   :  { %v1049_v48 = vadd.f32 %v2087_v40, %v1048_v63  ;;  %v1507_v24 = vpop.f32.mrb[54].mxu1 }
 0x281   :  { %v1149_v9 = vadd.f32 %v1057_v3, %v2335_v44  ;;  %v1060_v20 = vadd.f32 %v1507_v24, %v2087_v40  ;;  %v1051_v53 = vpop.f32.mrb[55].mxu1 }
 0x282   :  { %v1147_v27 = vadd.f32 %v1049_v48, %v2336_v11  ;;  %v1052_v49 = vadd.f32 %v2087_v40, %v1051_v53 }
 0x283   :  { %1213 = vst.msk [vmem:[#allocation11 + $0x1b0] sm:$0xff] %vm205_vm0, %v1149_v9  ;;  %v1150_v22 = vadd.f32 %v1060_v20, %v2337_v29 }
 0x284   :  { %1211 = vst.msk [vmem:[#allocation11 + $0x1a0] sm:$0xff] %vm205_vm0, %v1147_v27  ;;  %v1148_v54 = vadd.f32 %v1052_v49, %v2338_v7 }
 0x285   :  { %1214 = vst.msk [vmem:[#allocation11 + $0x1b8] sm:$0xff] %vm205_vm0, %v1150_v22 }
 0x286   :  { %1212 = vst.msk [vmem:[#allocation11 + $0x1a8] sm:$0xff] %vm205_vm0, %v1148_v54  ;;  %v1510_v25 = vpop.f32.mrb[56].mxu1 }
 0x287   :  { %v1073_v50 = vadd.f32 %v1510_v25, %v2087_v40  ;;  %v1064_v0 = vpop.f32.mrb[57].mxu1 }
 0x288   :  { %v1065_v34 = vadd.f32 %v2087_v40, %v1064_v0  ;;  %v1511_v59 = vpop.f32.mrb[58].mxu1 }
 0x289   :  { %v1153_v30 = vadd.f32 %v1073_v50, %v2339_v39  ;;  %v1076_v55 = vadd.f32 %v1511_v59, %v2087_v40  ;;  %v1067_v12 = vpop.f32.mrb[59].mxu1 }
 0x28a   :  { %v1151_v57 = vadd.f32 %v1065_v34, %v2340_v26  ;;  %v1068_v60 = vadd.f32 %v2087_v40, %v1067_v12 }
 0x28b   :  { %1217 = vst.msk [vmem:[#allocation11 + $0x1d0] sm:$0xff] %vm205_vm0, %v1153_v30  ;;  %v1154_v56 = vadd.f32 %v1076_v55, %v2341_v8 }
 0x28c   :  { %1215 = vst.msk [vmem:[#allocation11 + $0x1c0] sm:$0xff] %vm205_vm0, %v1151_v57  ;;  %v1152_v28 = vadd.f32 %v1530_v35, %v1068_v60 }
 0x28d   :  { %1218 = vst.msk [vmem:[#allocation11 + $0x1d8] sm:$0xff] %vm205_vm0, %v1154_v56 }
 0x28e   :  { %1216 = vst.msk [vmem:[#allocation11 + $0x1c8] sm:$0xff] %vm205_vm0, %v1152_v28  ;;  %v1514_v1 = vpop.f32.mrb[60].mxu1 }
 0x28f   :  { %v1089_v52 = vadd.f32 %v1514_v1, %v2087_v40  ;;  %v1080_v31 = vpop.f32.mrb[61].mxu1 }
 0x290   :  { %v1081_v61 = vadd.f32 %v2087_v40, %v1080_v31  ;;  %v1515_v17 = vpop.f32.mrb[62].mxu1 }
 0x291   :  { %v1157_v16 = vadd.f32 %v1089_v52, %v2342_v33  ;;  %v1092_v4 = vadd.f32 %v1515_v17, %v2087_v40  ;;  %v1083_v36 = vpop.f32.mrb[63].mxu1 }
 0x292   :  { %v1155_v62 = vadd.f32 %v1531_v13, %v1081_v61  ;;  %v1084_v32 = vadd.f32 %v2087_v40, %v1083_v36 }
 0x293   :  { %1221 = vst.msk [vmem:[#allocation11 + $0x1f0] sm:$0xff] %vm205_vm0, %v1157_v16  ;;  %v1158_v46 = vadd.f32 %v1532_v5, %v1092_v4 }
 0x294   :  { %1219 = vst.msk [vmem:[#allocation11 + $0x1e0] sm:$0xff] %vm205_vm0, %v1155_v62  ;;  %v1156_v21 = vadd.f32 %v1533_v41, %v1084_v32 }
 0x295   :  { %1222 = vst.msk [vmem:[#allocation11 + $0x1f8] sm:$0xff] %vm205_vm0, %v1158_v46 }
 0x296   :  { %1220 = vst.msk [vmem:[#allocation11 + $0x1e8] sm:$0xff] %vm205_vm0, %v1156_v21 }
 0x297   :  { %1655 = shalt.err (!%p1652_p2)
}
 0x298   :  { %s1656_s9 = scalar_lea.hbm %s2297_s5, 8192 }
 0x299   :  { %p1657_p3 = scmp.ne.s32.totalorder %s2297_s5, %s1656_s9  ;;  %p1660_p4 = scmp.lt.u32.totalorder %s1656_s9, %s2297_s5 }
 0x29b   :  { %p1662_p5 = pnand %p1660_p4, %p1657_p3 }
 0x29d   :  { %1665 = shalt.err (!%p1662_p5)
}
 0x29e   :  { %1234 = dma.vmem_to_hbm [thread:$0]  %s1229_s30, 8192, %s2297_s5, [#allocation4], %s1679_s3, %s1679_s3, %s1680_s28  }
 0x29f   :  { %1672 = dma.done.wait [#allocation4], 8192  }
 0x2a0   :  { %1673 = vsyncadd [#allocation4], 4294959104 }
 0x2a1   :  { %1238 = vsyncpa [#allocation3], 1 }
 0x2a2   :  { %1239 = vsyncpa [#allocation6], 1 }
 0x2a3   :  { %1240 = vsyncpa [#allocation9], 1 }
 0x2a4   :  { %1241 = vsyncpa [#allocation4], 1 }

</bundles_post_ra>
